<compile_context>
chip_gen: v7x
topology: tpu7x:2x2x1
jax: 0.10.0
libtpu: 0.0.40
codegen_flags: <defaults>
</compile_context>

<pallas_src>
import numpy as np
import jax
import jax.numpy as jnp
from jax.experimental import pallas as pl
from jax.experimental.pallas import tpu as pltpu

# ----------------------------- model geometry ------------------------------
B = 2
H_IN, W_IN, C_IN = 7, 11, 17
C1, C2, C3 = 128, 256, 128
KH1, KW1 = 3, 5
KH2 = KW2 = 3
KH3 = KW3 = 3
H1, W1 = H_IN - KH1 + 1, W_IN - KW1 + 1      # 5, 7
H2, W2 = H1 - KH2 + 1, W1 - KW2 + 1          # 3, 5
H3, W3 = H2 - KH3 + 1, W2 - KW3 + 1          # 1, 3
HID1, HID2 = 128, 32
N_OUT = 4                                    # number of actions ("outputs")
BN_EPS = 1e-5

assert C3 * H3 * W3 == 384                   # matches nn.Linear(384, 128)

# Flat-grid bookkeeping: every activation lives on the conv1-output grid,
# row = b*GRID + y*W1 + x.  A 3x3 conv on that grid is a gather of rows shifted
# by dy*W1 + dx; lin1 is a 1xW3 "conv" on the conv3 grid.
GRID = H1 * W1                                                # 35 rows / sample
OFF3 = tuple(dy * W1 + dx for dy in range(3) for dx in range(3))
OFF_LIN1 = tuple(range(W3))                                   # (0, 1, 2)

N_LIN = (B - 1) * GRID + 1                   # 36: covers rows 0 and 35
N_C3 = N_LIN + max(OFF_LIN1)                 # 38
N_C2 = N_C3 + max(OFF3)                      # 54
N_C1 = N_C2 + max(OFF3)                      # 70 == B * GRID (no padding needed)
assert N_C1 == B * GRID


# --------------------------------- kernel ----------------------------------
def dqn_kernel(p1_ref,
               w1_ref, t1_ref, w2_ref, t2_ref, w3_ref, t3_ref,
               wl1_ref, bl1_ref, wl2_ref, bl2_ref, wh_ref, bh_ref,
               out_ref):
    """Whole batched DQN forward: 6 MXU matmuls, fully resident in VMEM."""
    f32, bf16 = jnp.float32, jnp.bfloat16

    def mm(lhs, w_ref, bias_ref):
        # bf16 MXU operands, f32 accumulate, f32 epilogue.
        return jnp.dot(lhs.astype(bf16), w_ref[...],
                       preferred_element_type=f32) + bias_ref[...]

    def patches(act, offsets, n_rows):
        # im2col along lanes: concat row-shifted slabs (each Cin lanes wide).
        return jnp.concatenate([act[s:s + n_rows, :] for s in offsets], axis=1)

    # conv1 + bn1 + relu  (im2col LHS pre-built in the wrapper)
    a1 = jnp.maximum(mm(p1_ref[...], w1_ref, t1_ref), 0.0)                # (70, 128)
    # conv2 + bn2 + relu
    a2 = jnp.maximum(mm(patches(a1, OFF3, N_C2), w2_ref, t2_ref), 0.0)    # (54, 256)
    # conv3 + bn3 + relu
    a3 = jnp.maximum(mm(patches(a2, OFF3, N_C3), w3_ref, t3_ref), 0.0)    # (38, 128)
    # flatten (PyTorch NCHW order folded into wl1) + lin1 + relu
    h1 = jnp.maximum(mm(patches(a3, OFF_LIN1, N_LIN), wl1_ref, bl1_ref), 0.0)  # (36, 128)
    # lin2 + relu
    h2 = jnp.maximum(mm(h1, wl2_ref, bl2_ref), 0.0)                       # (36, 32)
    # head (+ trivial .view(B, -1))
    o = mm(h2, wh_ref, bh_ref)                                            # (36, 4)

    # One valid row per sample, at grid row b*GRID.
    out_ref[...] = jnp.concatenate(
        [o[b * GRID:b * GRID + 1, :] for b in range(B)], axis=0)          # (B, 4)


# -------------------------------- wrapper -----------------------------------
def _fold_conv(w_oihw, cb, bn):
    """Fold conv bias + inference BatchNorm into (bf16 weight, f32 shift)."""
    gamma, beta, mean, var = bn
    s = gamma / jnp.sqrt(var + BN_EPS)                       # (Cout,)
    shift = cb * s + beta - mean * s                         # (Cout,)
    cout = w_oihw.shape[0]
    w = jnp.transpose(w_oihw, (2, 3, 1, 0)).reshape(-1, cout)  # (kh*kw*cin, cout)
    return (w * s[None, :]).astype(jnp.bfloat16), shift[None, :].astype(jnp.float32)


@jax.jit
def dqn_forward_pallas(x_nchw, p):
    x = jnp.transpose(x_nchw, (0, 2, 3, 1)).astype(jnp.float32)   # (B, 7, 11, 17)

    # conv1 im2col in the wrapper: rows ordered (b, y, x), cols (dy, dx, cin).
    p1 = jnp.concatenate(
        [x[:, dy:dy + H1, dx:dx + W1, :]
         for dy in range(KH1) for dx in range(KW1)],
        axis=-1).reshape(B * H1 * W1, KH1 * KW1 * C_IN).astype(jnp.bfloat16)

    w1, t1 = _fold_conv(p['conv1_w'], p['conv1_b'], p['bn1'])
    w2, t2 = _fold_conv(p['conv2_w'], p['conv2_b'], p['bn2'])
    w3, t3 = _fold_conv(p['conv3_w'], p['conv3_b'], p['bn3'])

    # lin1 consumes the PyTorch NCHW flatten (index = c*W3 + w, H3 == 1); the
    # kernel's in-kernel flatten order is (w, c), so permute rows accordingly.
    wl1 = (p['lin1_w'].T.reshape(C3, W3, HID1).transpose(1, 0, 2)
           .reshape(W3 * C3, HID1)).astype(jnp.bfloat16)

    f32 = jnp.float32
    args = (p1,
            w1, t1, w2, t2, w3, t3,
            wl1, p['lin1_b'][None, :].astype(f32),
            p['lin2_w'].T.astype(jnp.bfloat16), p['lin2_b'][None, :].astype(f32),
            p['head_w'].T.astype(jnp.bfloat16), p['head_b'][None, :].astype(f32))

    # Total resident footprint ~2 MB: keep everything whole-array in VMEM,
    # single gridless invocation.  (On v7x one could add a parallel B-grid to
    # use both TensorCores, but the batch is already folded into matmul M.)
    return pl.pallas_call(
        dqn_kernel,
        out_shape=jax.ShapeDtypeStruct((B, N_OUT), jnp.float32),
        in_specs=[pl.BlockSpec(memory_space=pltpu.MemorySpace.VMEM)] * len(args),
        out_specs=pl.BlockSpec(memory_space=pltpu.MemorySpace.VMEM),
    )(*args)


# ------------------------- pure-JAX reference (NCHW) ------------------------
def dqn_forward_reference(x_nchw, p):
    def conv(x, w, b):
        y = jax.lax.conv_general_dilated(
            x, w, window_strides=(1, 1), padding='VALID',
            dimension_numbers=('NCHW', 'OIHW', 'NCHW'))
        return y + b[None, :, None, None]

    def bn(x, gamma, beta, mean, var):
        inv = gamma / jnp.sqrt(var + BN_EPS)
        return (x - mean[None, :, None, None]) * inv[None, :, None, None] \
            + beta[None, :, None, None]

    relu = lambda v: jnp.maximum(v, 0.0)
    x = relu(bn(conv(x_nchw, p['conv1_w'], p['conv1_b']), *p['bn1']))
    x = relu(bn(conv(x, p['conv2_w'], p['conv2_b']), *p['bn2']))
    x = relu(bn(conv(x, p['conv3_w'], p['conv3_b']), *p['bn3']))
    x = x.reshape(x.shape[0], -1)              # NCHW flatten (C, H, W) order
    x = relu(x @ p['lin1_w'].T + p['lin1_b'])
    x = relu(x @ p['lin2_w'].T + p['lin2_b'])
    return (x @ p['head_w'].T + p['head_b']).reshape(x.shape[0], -1)


# ------------------------- deterministic parameters -------------------------
def init_params(key):
    ks = jax.random.split(key, 15)

    def n(k, shape, scale):
        return scale * jax.random.normal(k, shape, dtype=jnp.float32)

    def bn_params(k, c):
        k1, k2, k3, k4 = jax.random.split(k, 4)
        gamma = 1.0 + 0.1 * jax.random.normal(k1, (c,), dtype=jnp.float32)
        beta = 0.1 * jax.random.normal(k2, (c,), dtype=jnp.float32)
        mean = 0.1 * jax.random.normal(k3, (c,), dtype=jnp.float32)
        var = jax.random.uniform(k4, (c,), jnp.float32, 0.5, 1.5)
        return (gamma, beta, mean, var)

    return dict(
        conv1_w=n(ks[0], (C1, C_IN, KH1, KW1), 0.06),
        conv1_b=n(ks[1], (C1,), 0.05),
        bn1=bn_params(ks[2], C1),
        conv2_w=n(ks[3], (C2, C1, KH2, KW2), 0.03),
        conv2_b=n(ks[4], (C2,), 0.05),
        bn2=bn_params(ks[5], C2),
        conv3_w=n(ks[6], (C3, C2, KH3, KW3), 0.02),
        conv3_b=n(ks[7], (C3,), 0.05),
        bn3=bn_params(ks[8], C3),
        lin1_w=n(ks[9], (HID1, C3 * H3 * W3), 0.05),
        lin1_b=n(ks[10], (HID1,), 0.05),
        lin2_w=n(ks[11], (HID2, HID1), 0.09),
        lin2_b=n(ks[12], (HID2,), 0.05),
        head_w=n(ks[13], (N_OUT, HID2), 0.18),
        head_b=n(ks[14], (N_OUT,), 0.05),
    )


if __name__ == "__main__":
    key = jax.random.PRNGKey(0)
    pkey, xkey = jax.random.split(key)
    params = init_params(pkey)
    x = jax.random.normal(xkey, (B, C_IN, H_IN, W_IN), dtype=jnp.float32)

    out = jax.block_until_ready(dqn_forward_pallas(x, params))
    ref = dqn_forward_reference(x, params)
    # Tolerance accounts for bf16 MXU operands (f32 accumulate / epilogues).
    np.testing.assert_allclose(np.asarray(out), np.asarray(ref),
                               rtol=3e-2, atol=3e-2)
    assert out.shape == (B, N_OUT)
    print("KERNEL_OK")
</pallas_src>

<mosaic_0001>
module attributes {stable_mosaic.version = 11 : i64} {
  func.func @dqn_kernel(%arg0: memref<70x255xbf16, #tpu.memory_space<vmem>>, %arg1: memref<255x128xbf16, #tpu.memory_space<vmem>>, %arg2: memref<1x128xf32, #tpu.memory_space<vmem>>, %arg3: memref<1152x256xbf16, #tpu.memory_space<vmem>>, %arg4: memref<1x256xf32, #tpu.memory_space<vmem>>, %arg5: memref<2304x128xbf16, #tpu.memory_space<vmem>>, %arg6: memref<1x128xf32, #tpu.memory_space<vmem>>, %arg7: memref<384x128xbf16, #tpu.memory_space<vmem>>, %arg8: memref<1x128xf32, #tpu.memory_space<vmem>>, %arg9: memref<128x32xbf16, #tpu.memory_space<vmem>>, %arg10: memref<1x32xf32, #tpu.memory_space<vmem>>, %arg11: memref<32x4xbf16, #tpu.memory_space<vmem>>, %arg12: memref<1x4xf32, #tpu.memory_space<vmem>>, %arg13: memref<2x4xf32, #tpu.memory_space<vmem>>) attributes {dimension_semantics = [], scalar_prefetch = 0 : i64, scratch_operands = 0 : i64, tpu.core_type = #tpu.core_type<tc>} {
    %c0 = arith.constant 0 : index
    %c0_0 = arith.constant 0 : index
    %0 = vector.load %arg0[%c0, %c0_0] : memref<70x255xbf16, #tpu.memory_space<vmem>>, vector<70x255xbf16>
    %c0_1 = arith.constant 0 : index
    %c0_2 = arith.constant 0 : index
    %1 = vector.load %arg1[%c0_1, %c0_2] : memref<255x128xbf16, #tpu.memory_space<vmem>>, vector<255x128xbf16>
    %cst = arith.constant dense<0.000000e+00> : vector<70x128xf32>
    %2 = tpu.matmul %0, %1, %cst {dimension_numbers = #tpu.dot_dimension_numbers<[1], [0], [0], [1], [0, 0, 1, 1], [], []>} : vector<70x255xbf16>, vector<255x128xbf16>, vector<70x128xf32> -> vector<70x128xf32>
    %c0_3 = arith.constant 0 : index
    %c0_4 = arith.constant 0 : index
    %3 = vector.load %arg2[%c0_3, %c0_4] : memref<1x128xf32, #tpu.memory_space<vmem>>, vector<1x128xf32>
    %4 = vector.broadcast %3 : vector<1x128xf32> to vector<70x128xf32>
    %5 = arith.addf %2, %4 : vector<70x128xf32>
    %cst_5 = arith.constant 0.000000e+00 : f32
    %6 = vector.broadcast %cst_5 : f32 to vector<70x128xf32>
    %7 = arith.maximumf %5, %6 : vector<70x128xf32>
    %8 = vector.extract_strided_slice %7 {offsets = [0, 0], sizes = [54, 128], strides = [1, 1]} : vector<70x128xf32> to vector<54x128xf32>
    %9 = vector.extract_strided_slice %7 {offsets = [1, 0], sizes = [54, 128], strides = [1, 1]} : vector<70x128xf32> to vector<54x128xf32>
    %10 = vector.extract_strided_slice %7 {offsets = [2, 0], sizes = [54, 128], strides = [1, 1]} : vector<70x128xf32> to vector<54x128xf32>
    %11 = vector.extract_strided_slice %7 {offsets = [7, 0], sizes = [54, 128], strides = [1, 1]} : vector<70x128xf32> to vector<54x128xf32>
    %12 = vector.extract_strided_slice %7 {offsets = [8, 0], sizes = [54, 128], strides = [1, 1]} : vector<70x128xf32> to vector<54x128xf32>
    %13 = vector.extract_strided_slice %7 {offsets = [9, 0], sizes = [54, 128], strides = [1, 1]} : vector<70x128xf32> to vector<54x128xf32>
    %14 = vector.extract_strided_slice %7 {offsets = [14, 0], sizes = [54, 128], strides = [1, 1]} : vector<70x128xf32> to vector<54x128xf32>
    %15 = vector.extract_strided_slice %7 {offsets = [15, 0], sizes = [54, 128], strides = [1, 1]} : vector<70x128xf32> to vector<54x128xf32>
    %16 = vector.extract_strided_slice %7 {offsets = [16, 0], sizes = [54, 128], strides = [1, 1]} : vector<70x128xf32> to vector<54x128xf32>
    %17 = tpu.concatenate %8, %9, %10, %11, %12, %13, %14, %15, %16 in 1 : vector<54x128xf32>, vector<54x128xf32>, vector<54x128xf32>, vector<54x128xf32>, vector<54x128xf32>, vector<54x128xf32>, vector<54x128xf32>, vector<54x128xf32>, vector<54x128xf32> -> vector<54x1152xf32>
    %18 = arith.truncf %17 : vector<54x1152xf32> to vector<54x1152xbf16>
    %c0_6 = arith.constant 0 : index
    %c0_7 = arith.constant 0 : index
    %19 = vector.load %arg3[%c0_6, %c0_7] : memref<1152x256xbf16, #tpu.memory_space<vmem>>, vector<1152x256xbf16>
    %cst_8 = arith.constant dense<0.000000e+00> : vector<54x256xf32>
    %20 = tpu.matmul %18, %19, %cst_8 {dimension_numbers = #tpu.dot_dimension_numbers<[1], [0], [0], [1], [0, 0, 1, 1], [], []>} : vector<54x1152xbf16>, vector<1152x256xbf16>, vector<54x256xf32> -> vector<54x256xf32>
    %c0_9 = arith.constant 0 : index
    %c0_10 = arith.constant 0 : index
    %21 = vector.load %arg4[%c0_9, %c0_10] : memref<1x256xf32, #tpu.memory_space<vmem>>, vector<1x256xf32>
    %22 = vector.broadcast %21 : vector<1x256xf32> to vector<54x256xf32>
    %23 = arith.addf %20, %22 : vector<54x256xf32>
    %cst_11 = arith.constant 0.000000e+00 : f32
    %24 = vector.broadcast %cst_11 : f32 to vector<54x256xf32>
    %25 = arith.maximumf %23, %24 : vector<54x256xf32>
    %26 = vector.extract_strided_slice %25 {offsets = [0, 0], sizes = [38, 256], strides = [1, 1]} : vector<54x256xf32> to vector<38x256xf32>
    %27 = vector.extract_strided_slice %25 {offsets = [1, 0], sizes = [38, 256], strides = [1, 1]} : vector<54x256xf32> to vector<38x256xf32>
    %28 = vector.extract_strided_slice %25 {offsets = [2, 0], sizes = [38, 256], strides = [1, 1]} : vector<54x256xf32> to vector<38x256xf32>
    %29 = vector.extract_strided_slice %25 {offsets = [7, 0], sizes = [38, 256], strides = [1, 1]} : vector<54x256xf32> to vector<38x256xf32>
    %30 = vector.extract_strided_slice %25 {offsets = [8, 0], sizes = [38, 256], strides = [1, 1]} : vector<54x256xf32> to vector<38x256xf32>
    %31 = vector.extract_strided_slice %25 {offsets = [9, 0], sizes = [38, 256], strides = [1, 1]} : vector<54x256xf32> to vector<38x256xf32>
    %32 = vector.extract_strided_slice %25 {offsets = [14, 0], sizes = [38, 256], strides = [1, 1]} : vector<54x256xf32> to vector<38x256xf32>
    %33 = vector.extract_strided_slice %25 {offsets = [15, 0], sizes = [38, 256], strides = [1, 1]} : vector<54x256xf32> to vector<38x256xf32>
    %34 = vector.extract_strided_slice %25 {offsets = [16, 0], sizes = [38, 256], strides = [1, 1]} : vector<54x256xf32> to vector<38x256xf32>
    %35 = tpu.concatenate %26, %27, %28, %29, %30, %31, %32, %33, %34 in 1 : vector<38x256xf32>, vector<38x256xf32>, vector<38x256xf32>, vector<38x256xf32>, vector<38x256xf32>, vector<38x256xf32>, vector<38x256xf32>, vector<38x256xf32>, vector<38x256xf32> -> vector<38x2304xf32>
    %36 = arith.truncf %35 : vector<38x2304xf32> to vector<38x2304xbf16>
    %c0_12 = arith.constant 0 : index
    %c0_13 = arith.constant 0 : index
    %37 = vector.load %arg5[%c0_12, %c0_13] : memref<2304x128xbf16, #tpu.memory_space<vmem>>, vector<2304x128xbf16>
    %cst_14 = arith.constant dense<0.000000e+00> : vector<38x128xf32>
    %38 = tpu.matmul %36, %37, %cst_14 {dimension_numbers = #tpu.dot_dimension_numbers<[1], [0], [0], [1], [0, 0, 1, 1], [], []>} : vector<38x2304xbf16>, vector<2304x128xbf16>, vector<38x128xf32> -> vector<38x128xf32>
    %c0_15 = arith.constant 0 : index
    %c0_16 = arith.constant 0 : index
    %39 = vector.load %arg6[%c0_15, %c0_16] : memref<1x128xf32, #tpu.memory_space<vmem>>, vector<1x128xf32>
    %40 = vector.broadcast %39 : vector<1x128xf32> to vector<38x128xf32>
    %41 = arith.addf %38, %40 : vector<38x128xf32>
    %cst_17 = arith.constant 0.000000e+00 : f32
    %42 = vector.broadcast %cst_17 : f32 to vector<38x128xf32>
    %43 = arith.maximumf %41, %42 : vector<38x128xf32>
    %44 = vector.extract_strided_slice %43 {offsets = [0, 0], sizes = [36, 128], strides = [1, 1]} : vector<38x128xf32> to vector<36x128xf32>
    %45 = vector.extract_strided_slice %43 {offsets = [1, 0], sizes = [36, 128], strides = [1, 1]} : vector<38x128xf32> to vector<36x128xf32>
    %46 = vector.extract_strided_slice %43 {offsets = [2, 0], sizes = [36, 128], strides = [1, 1]} : vector<38x128xf32> to vector<36x128xf32>
    %47 = tpu.concatenate %44, %45, %46 in 1 : vector<36x128xf32>, vector<36x128xf32>, vector<36x128xf32> -> vector<36x384xf32>
    %48 = arith.truncf %47 : vector<36x384xf32> to vector<36x384xbf16>
    %c0_18 = arith.constant 0 : index
    %c0_19 = arith.constant 0 : index
    %49 = vector.load %arg7[%c0_18, %c0_19] : memref<384x128xbf16, #tpu.memory_space<vmem>>, vector<384x128xbf16>
    %cst_20 = arith.constant dense<0.000000e+00> : vector<36x128xf32>
    %50 = tpu.matmul %48, %49, %cst_20 {dimension_numbers = #tpu.dot_dimension_numbers<[1], [0], [0], [1], [0, 0, 1, 1], [], []>} : vector<36x384xbf16>, vector<384x128xbf16>, vector<36x128xf32> -> vector<36x128xf32>
    %c0_21 = arith.constant 0 : index
    %c0_22 = arith.constant 0 : index
    %51 = vector.load %arg8[%c0_21, %c0_22] : memref<1x128xf32, #tpu.memory_space<vmem>>, vector<1x128xf32>
    %52 = vector.broadcast %51 : vector<1x128xf32> to vector<36x128xf32>
    %53 = arith.addf %50, %52 : vector<36x128xf32>
    %cst_23 = arith.constant 0.000000e+00 : f32
    %54 = vector.broadcast %cst_23 : f32 to vector<36x128xf32>
    %55 = arith.maximumf %53, %54 : vector<36x128xf32>
    %56 = arith.truncf %55 : vector<36x128xf32> to vector<36x128xbf16>
    %c0_24 = arith.constant 0 : index
    %c0_25 = arith.constant 0 : index
    %57 = vector.load %arg9[%c0_24, %c0_25] : memref<128x32xbf16, #tpu.memory_space<vmem>>, vector<128x32xbf16>
    %cst_26 = arith.constant dense<0.000000e+00> : vector<36x32xf32>
    %58 = tpu.matmul %56, %57, %cst_26 {dimension_numbers = #tpu.dot_dimension_numbers<[1], [0], [0], [1], [0, 0, 1, 1], [], []>} : vector<36x128xbf16>, vector<128x32xbf16>, vector<36x32xf32> -> vector<36x32xf32>
    %c0_27 = arith.constant 0 : index
    %c0_28 = arith.constant 0 : index
    %59 = vector.load %arg10[%c0_27, %c0_28] : memref<1x32xf32, #tpu.memory_space<vmem>>, vector<1x32xf32>
    %60 = vector.broadcast %59 : vector<1x32xf32> to vector<36x32xf32>
    %61 = arith.addf %58, %60 : vector<36x32xf32>
    %cst_29 = arith.constant 0.000000e+00 : f32
    %62 = vector.broadcast %cst_29 : f32 to vector<36x32xf32>
    %63 = arith.maximumf %61, %62 : vector<36x32xf32>
    %64 = arith.truncf %63 : vector<36x32xf32> to vector<36x32xbf16>
    %c0_30 = arith.constant 0 : index
    %c0_31 = arith.constant 0 : index
    %65 = vector.load %arg11[%c0_30, %c0_31] : memref<32x4xbf16, #tpu.memory_space<vmem>>, vector<32x4xbf16>
    %cst_32 = arith.constant dense<0.000000e+00> : vector<36x4xf32>
    %66 = tpu.matmul %64, %65, %cst_32 {dimension_numbers = #tpu.dot_dimension_numbers<[1], [0], [0], [1], [0, 0, 1, 1], [], []>} : vector<36x32xbf16>, vector<32x4xbf16>, vector<36x4xf32> -> vector<36x4xf32>
    %c0_33 = arith.constant 0 : index
    %c0_34 = arith.constant 0 : index
    %67 = vector.load %arg12[%c0_33, %c0_34] : memref<1x4xf32, #tpu.memory_space<vmem>>, vector<1x4xf32>
    %68 = vector.broadcast %67 : vector<1x4xf32> to vector<36x4xf32>
    %69 = arith.addf %66, %68 : vector<36x4xf32>
    %70 = vector.extract_strided_slice %69 {offsets = [0, 0], sizes = [1, 4], strides = [1, 1]} : vector<36x4xf32> to vector<1x4xf32>
    %71 = vector.extract_strided_slice %69 {offsets = [35, 0], sizes = [1, 4], strides = [1, 1]} : vector<36x4xf32> to vector<1x4xf32>
    %72 = tpu.concatenate %70, %71 in 0 : vector<1x4xf32>, vector<1x4xf32> -> vector<2x4xf32>
    %c0_35 = arith.constant 0 : index
    %c0_36 = arith.constant 0 : index
    %73 = vector.load %arg13[%c0_35, %c0_36] : memref<2x4xf32, #tpu.memory_space<vmem>>, vector<2x4xf32>
    tpu.vector_store %arg13[%c0_35, %c0_36], %72 {strides = array<i32>} : memref<2x4xf32, #tpu.memory_space<vmem>>, vector<2x4xf32>,
    return
  }
}

</mosaic_0001>

<bundles_post_ra>
// kernel: dqn_forward_pallas.1
= control target key start
LH: loop header
LB: loop body
LE: loop exit
PB: predicated region body
PF: predicated region fallthrough
CT: control target
= control target key end

     0   :  { %vm247_vm0 = vcmask 1046528   ;;  %vm231_vm1 = vcmask 1039360   ;;  %vm248_vm2 = vcmask 1047552   ;;  %v5568_v12 = vmov 65535   ;;  %s7488_s0 = inlined_call_operand.vmem [shape: bf16[70,255], index: 0, kind: input, shape index: {}]   ;;  %s7489_s1 = inlined_call_operand.vmem [shape: bf16[255,128], index: 1, kind: input, shape index: {}]   ;;  %s7490_s2 = inlined_call_operand.vmem [shape: f32[1,128], index: 2, kind: input, shape index: {}]   ;;  %s7491_s3 = inlined_call_operand.vmem [shape: bf16[1152,256], index: 3, kind: input, shape index: {}]   ;;  %s7492_s4 = inlined_call_operand.vmem [shape: f32[1,256], index: 4, kind: input, shape index: {}]   ;;  %s7493_s5 = inlined_call_operand.vmem [shape: bf16[2304,128], index: 5, kind: input, shape index: {}]   ;;  %s7494_s6 = inlined_call_operand.vmem [shape: f32[1,128], index: 6, kind: input, shape index: {}]   ;;  %s7495_s7 = inlined_call_operand.vmem [shape: bf16[384,128], index: 7, kind: input, shape index: {}]   ;;  %s7496_s8 = inlined_call_operand.vmem [shape: f32[1,128], index: 8, kind: input, shape index: {}]   ;;  %s7497_s9 = inlined_call_operand.vmem [shape: bf16[128,32], index: 9, kind: input, shape index: {}]   ;;  %s7498_s10 = inlined_call_operand.vmem [shape: f32[1,32], index: 10, kind: input, shape index: {}]   ;;  %s7499_s11 = inlined_call_operand.vmem [shape: bf16[32,4], index: 11, kind: input, shape index: {}]   ;;  %s7500_s12 = inlined_call_operand.vmem [shape: f32[1,4], index: 12, kind: input, shape index: {}]   ;;  %s7501_s13 = inlined_call_operand.hbm [shape: f32[2,4], index: 13, kind: output, shape index: {}]  }
   0x1   :  { %v5120_v0 = vld [vmem:[%s7489_s1 + $0x40] sm:$0xff]   ;;  %v5122_v2 = vld [vmem:[%s7489_s1 + $0x48] sm:$0xff]   ;;  %v5124_v4 = vld [vmem:[%s7489_s1 + $0x50] sm:$0xff]   ;;  %v249_v13 = vsel %vm247_vm0, 4294967295, %v5568_v12 }
   0x2   :  { %v5121_v1 = vld [vmem:[%s7489_s1] sm:$0xff]   ;;  %4548 = vmatprep.subr.bf16.mxu0 %v5120_v0  ;;  %v5123_v3 = vld [vmem:[%s7489_s1 + $0x8] sm:$0xff]   ;;  %v5125_v5 = vld [vmem:[%s7489_s1 + $0x10] sm:$0xff]   ;;  %v250_v18 = vsel %vm248_vm2, %v249_v13, 0 }
   0x3   :  { %4549 = vmatpush3.bf16.msra.mxu0 %v5121_v1  ;;  %v5126_v6 = vld [vmem:[%s7489_s1 + $0x58] sm:$0xff]   ;;  %v5128_v8 = vld [vmem:[%s7489_s1 + $0x60] sm:$0xff]   ;;  %v5130_v10 = vld [vmem:[%s7489_s1 + $0x68] sm:$0xff]  }
   0x4   :  { %4550 = vmatprep.subr.bf16.mxu0 %v5122_v2  ;;  %v5127_v7 = vld [vmem:[%s7489_s1 + $0x18] sm:$0xff]   ;;  %v5129_v9 = vld [vmem:[%s7489_s1 + $0x20] sm:$0xff]   ;;  %v5131_v14 = vld [vmem:[%s7489_s1 + $0x28] sm:$0xff]  }
   0x5   :  { %v5138_v11 = vld [vmem:[%s7488_s0 + $0x4] ss:$8 sps:$4 sm:$0xff]   ;;  %v5132_v15 = vld [vmem:[%s7489_s1 + $0x70] sm:$0xff]   ;;  %v5134_v16 = vld [vmem:[%s7489_s1 + $0x78] sm:$0xff]  }
   0x6   :  { %4214 = vmatprep.mubr.msk.bf16.mxu0 %vm231_vm1, %v5138_v11  ;;  %v5133_v17 = vld [vmem:[%s7489_s1 + $0x30] sm:$0xff]   ;;  %v5150_v19 = vld [vmem:[%s7491_s3 + $0x4] ss:$8 sps:$4 sm:$0xff]   ;;  %v5152_v20 = vld [vmem:[%s7491_s3] ss:$8 sps:$4 sm:$0xff]   ;;  %v252_v22 = vand.u32 %v5134_v16, %v250_v18 }
   0x7   :  { %4551 = vmatpush3.bf16.msra.mxu0 %v5123_v3  ;;  %v5153_v21 = vld [vmem:[%s7491_s3 + $0x14] ss:$8 sps:$4 sm:$0xff]   ;;  %1348 = vmatprep.subr.bf16.mxu1 %v5150_v19  ;;  %v5155_v23 = vld [vmem:[%s7491_s3 + $0x10] ss:$8 sps:$4 sm:$0xff]   ;;  %v5156_v24 = vld [vmem:[%s7491_s3 + $0x24] ss:$8 sps:$4 sm:$0xff]  }
   0x8   :  { %4552 = vmatprep.subr.bf16.mxu0 %v5124_v4  ;;  %1349 = vmatpush1.bf16.msra.mxu1 %v5152_v20  ;;  %v5135_v25 = vld [vmem:[%s7489_s1 + $0x38] sm:$0xff]   ;;  %v5158_v26 = vld [vmem:[%s7491_s3 + $0x20] ss:$8 sps:$4 sm:$0xff]   ;;  %v5162_v31 = vld [vmem:[%s7491_s3 + $0x44] ss:$8 sps:$4 sm:$0xff]  }
   0x9   :  { %1350 = vmatprep.subr.bf16.mxu1 %v5153_v21  ;;  %v5136_v27 = vld [vmem:[%s7488_s0] ss:$8 sps:$4 sm:$0xff]   ;;  %v5159_v28 = vld [vmem:[%s7491_s3 + $0x34] ss:$8 sps:$4 sm:$0xff]   ;;  %v5161_v30 = vld [vmem:[%s7491_s3 + $0x30] ss:$8 sps:$4 sm:$0xff]  }
   0xa   :  { %v5139_v29 = vld [vmem:[%s7488_s0 + $0x14] ss:$8 sps:$4 sm:$0xff]   ;;  %v5164_v32 = vld [vmem:[%s7491_s3 + $0x40] ss:$8 sps:$4 sm:$0xff]   ;;  %v5141_v33 = vld [vmem:[%s7488_s0 + $0x10] ss:$8 sps:$4 sm:$0xff]  }
   0xb   :  { %4553 = vmatpush3.bf16.msra.mxu0 %v5125_v5  ;;  %v5165_v34 = vld [vmem:[%s7491_s3 + $0x54] ss:$8 sps:$4 sm:$0xff]   ;;  %v5142_v35 = vld [vmem:[%s7488_s0 + $0x24] ss:$8 sps:$4 sm:$0xff]   ;;  %v5167_v36 = vld [vmem:[%s7491_s3 + $0x50] ss:$8 sps:$4 sm:$0xff]  }
   0xc   :  { %4554 = vmatprep.subr.bf16.mxu0 %v5126_v6  ;;  %1351 = vmatpush1.bf16.msra.mxu1 %v5155_v23  ;;  %v5168_v37 = vld [vmem:[%s7491_s3 + $0x64] ss:$8 sps:$4 sm:$0xff]   ;;  %v5170_v38 = vld [vmem:[%s7491_s3 + $0x60] ss:$8 sps:$4 sm:$0xff]   ;;  %v5171_v40 = vld [vmem:[%s7491_s3 + $0x74] ss:$8 sps:$4 sm:$0xff]  }
   0xd   :  { %1352 = vmatprep.subr.bf16.mxu1 %v5156_v24  ;;  %v5144_v39 = vld [vmem:[%s7488_s0 + $0x20] ss:$8 sps:$4 sm:$0xff]   ;;  %v5145_v41 = vld [vmem:[%s7488_s0 + $0x34] ss:$8 sps:$4 sm:$0xff]   ;;  %v5173_v42 = vld [vmem:[%s7491_s3 + $0x70] ss:$8 sps:$4 sm:$0xff]  }
   0xe   :  { %v5174_v43 = vld [vmem:[%s7491_s3 + $0x84] ss:$8 sps:$4 sm:$0xff]   ;;  %v5176_v45 = vld [vmem:[%s7491_s3 + $0x80] ss:$8 sps:$4 sm:$0xff]   ;;  %v5147_v46 = vld [vmem:[%s7488_s0 + $0x30] ss:$8 sps:$4 sm:$0xff]  }
   0xf   :  { %4555 = vmatpush3.bf16.msra.mxu0 %v5127_v7  ;;  %v54_v44 = vld [vmem:[%s7488_s0 + $0x40] sm:$0x77]  ;;  %v5177_v47 = vld [vmem:[%s7491_s3 + $0x94] ss:$8 sps:$4 sm:$0xff]   ;;  %v5179_v49 = vld [vmem:[%s7491_s3 + $0x90] ss:$8 sps:$4 sm:$0xff]  }
  0x10   :  { %4556 = vmatprep.subr.bf16.mxu0 %v5128_v8  ;;  %1353 = vmatpush1.bf16.msra.mxu1 %v5158_v26  ;;  %v4197_v48 = vcombine.high %v54_v44, %v54_v44  ;;  %v5180_v50 = vld [vmem:[%s7491_s3 + $0xa4] ss:$8 sps:$4 sm:$0xff]   ;;  %v5182_v51 = vld [vmem:[%s7491_s3 + $0xa0] ss:$8 sps:$4 sm:$0xff]   ;;  %v4196_v52 = vcombine.low %v54_v44, %v54_v44  ;;  %v5183_v53 = vld [vmem:[%s7491_s3 + $0xb4] ss:$8 sps:$4 sm:$0xff]  }
  0x11   :  { %1354 = vmatprep.subr.bf16.mxu1 %v5159_v28  ;;  %v5185_v54 = vld [vmem:[%s7491_s3 + $0xb0] ss:$8 sps:$4 sm:$0xff]   ;;  %v5186_v55 = vld [vmem:[%s7491_s3 + $0xc4] ss:$8 sps:$4 sm:$0xff]   ;;  %v5188_v56 = vld [vmem:[%s7491_s3 + $0xc0] ss:$8 sps:$4 sm:$0xff]  }
  0x12   :  { %v5189_v57 = vld [vmem:[%s7491_s3 + $0xd4] ss:$8 sps:$4 sm:$0xff]   ;;  %v5191_v58 = vld [vmem:[%s7491_s3 + $0xd0] ss:$8 sps:$4 sm:$0xff]   ;;  %v5192_v59 = vld [vmem:[%s7491_s3 + $0xe4] ss:$8 sps:$4 sm:$0xff]  }
  0x13   :  { %4557 = vmatpush3.bf16.msra.mxu0 %v5129_v9  ;;  %v5194_v60 = vld [vmem:[%s7491_s3 + $0xe0] ss:$8 sps:$4 sm:$0xff]   ;;  %v5195_v61 = vld [vmem:[%s7491_s3 + $0xf4] ss:$8 sps:$4 sm:$0xff]   ;;  %v5197_v62 = vld [vmem:[%s7491_s3 + $0xf0] ss:$8 sps:$4 sm:$0xff]  }
  0x14   :  { %4558 = vmatprep.subr.bf16.mxu0 %v5130_v10  ;;  %1355 = vmatpush1.bf16.msra.mxu1 %v5161_v30  ;;  %v5200_v63 = vld [vmem:[%s7491_s3 + $0x104] ss:$8 sps:$4 sm:$0xff]  }
  0x15   :  { %1356 = vmatprep.subr.bf16.mxu1 %v5162_v31 }
  0x17   :  { %4559 = vmatpush3.bf16.msra.mxu0 %v5131_v14 }
  0x18   :  { %4560 = vmatprep.subr.bf16.mxu0 %v5132_v15  ;;  %1357 = vmatpush1.bf16.msra.mxu1 %v5164_v32 }
  0x19   :  { %1358 = vmatprep.subr.bf16.mxu1 %v5165_v34 }
  0x1b   :  { %4561 = vmatpush3.bf16.msra.mxu0 %v5133_v17 }
  0x1c   :  { %4562 = vmatprep.subr.bf16.mxu0 %v252_v22  ;;  %1359 = vmatpush1.bf16.msra.mxu1 %v5167_v36 }
  0x1d   :  { %1360 = vmatprep.subr.bf16.mxu1 %v5168_v37 }
  0x1f   :  { %4563 = vmatpush3.bf16.msra.mxu0 %v5135_v25 }
  0x20   :  { %1361 = vmatpush1.bf16.msra.mxu1 %v5170_v38 }
  0x21   :  { %1362 = vmatprep.subr.bf16.mxu1 %v5171_v40 }
  0x22   :  { %287 = vmatmul.mubr.bf16.vlgmr.msra.gmra.mrb[0].mxu0 %v5136_v27 }
  0x23   :  { %4215 = vmatprep.mubr.msk.bf16.mxu0 %vm231_vm1, %v5139_v29 }
  0x24   :  { %1363 = vmatpush1.bf16.msra.mxu1 %v5173_v42 }
  0x25   :  { %1364 = vmatprep.subr.bf16.mxu1 %v5174_v43 }
  0x28   :  { %1365 = vmatpush1.bf16.msra.mxu1 %v5176_v45 }
  0x29   :  { %1366 = vmatprep.subr.bf16.mxu1 %v5177_v47 }
  0x2a   :  { %295 = vmatmul.mubr.bf16.gmra.mrb[4].mxu0 %v5141_v33 }
  0x2b   :  { %4216 = vmatprep.mubr.msk.bf16.mxu0 %vm231_vm1, %v5142_v35 }
  0x2c   :  { %1367 = vmatpush1.bf16.msra.mxu1 %v5179_v49 }
  0x2d   :  { %1368 = vmatprep.subr.bf16.mxu1 %v5180_v50 }
  0x30   :  { %1369 = vmatpush1.bf16.msra.mxu1 %v5182_v51 }
  0x31   :  { %1370 = vmatprep.subr.bf16.mxu1 %v5183_v53 }
  0x32   :  { %303 = vmatmul.mubr.bf16.gmra.mrb[8].mxu0 %v5144_v39 }
  0x33   :  { %4217 = vmatprep.mubr.msk.bf16.mxu0 %vm231_vm1, %v5145_v41 }
  0x34   :  { %1371 = vmatpush1.bf16.msra.mxu1 %v5185_v54 }
  0x35   :  { %1372 = vmatprep.subr.bf16.mxu1 %v5186_v55 }
  0x38   :  { %1373 = vmatpush1.bf16.msra.mxu1 %v5188_v56 }
  0x39   :  { %1374 = vmatprep.subr.bf16.mxu1 %v5189_v57 }
  0x3a   :  { %311 = vmatmul.mubr.bf16.gmra.mrb[12].mxu0 %v5147_v46 }
  0x3b   :  { %4218 = vmatprep.mubr.msk.bf16.mxu0 %vm231_vm1, %v4197_v48 }
  0x3c   :  { %1375 = vmatpush1.bf16.msra.mxu1 %v5191_v58 }
  0x3d   :  { %1376 = vmatprep.subr.bf16.mxu1 %v5192_v59 }
  0x40   :  { %1377 = vmatpush1.bf16.msra.mxu1 %v5194_v60 }
  0x41   :  { %1378 = vmatprep.subr.bf16.mxu1 %v5195_v61 }
  0x42   :  { %319 = vmatmul.mubr.bf16.gmra.mrb[16].mxu0 %v4196_v52 }
  0x44   :  { %1379 = vmatpush1.bf16.msra.mxu1 %v5197_v62 }
  0x45   :  { %1419 = vmatprep.subr.bf16.mxu1 %v5200_v63 }
  0x46   :  { %18 = vsyncpa [#allocation3], 0  ;;  %v5826_v1 = vld [vmem:[%s7490_s2] ss:$0 sm:$0xff]  ;;  %vm384_vm3 = vcmask 1040384   ;;  %vm362_vm4 = vcmask 1045504  }
  0x47   :  { %vm412_vm5 = vcmask 1041408   ;;  %v5198_v46 = vld [vmem:[%s7491_s3 + $0x100] ss:$8 sps:$4 sm:$0xff]   ;;  %v5203_v53 = vld [vmem:[%s7491_s3 + $0x114] ss:$8 sps:$4 sm:$0xff]   ;;  %vm5571_vm6 = vmmov 0  }
  0x48   :  { %v5201_v63 = vld [vmem:[%s7491_s3 + $0x110] ss:$8 sps:$4 sm:$0xff]   ;;  %vm4104_vm7 = vcmask 261120   ;;  %s5572_s25 = smov [#allocation2]   ;;  %vm4171_vm8 = vcmask 25600  }
  0xf5   :  { %v4564_v0 = vpop.f32.mrb[0].mxu0 }
  0xf6   :  { %v4565_v2 = vpop.f32.mrb[1].mxu0 }
  0xf7   :  { %v4566_v3 = vadd.f32 %v4565_v2, %v4564_v0  ;;  %v4567_v4 = vpop.f32.mrb[2].mxu0  ;;  %v5206_v0 = vld [vmem:[%s7491_s3 + $0x124] ss:$8 sps:$4 sm:$0xff]  }
  0xf8   :  { %v4568_v5 = vpop.f32.mrb[3].mxu0 }
  0xf9   :  { %v289_v6 = vadd.f32 %v4566_v3, %v5826_v1  ;;  %v4569_v7 = vadd.f32 %v4568_v5, %v4567_v4 }
  0xfb   :  { %v326_v8 = vmax.f32 %v289_v6, 0.0  ;;  %v292_v9 = vadd.f32 %v4569_v7, %v5826_v1 }
  0xfd   :  { %v5830_v10 = vmax.f32 %v292_v9, 0.0  ;;  %v4570_v11 = vpop.f32.mrb[4].mxu0  ;;  %v342_v13 = vrot.slane %v326_v8, 1  ;;  %v385_v14 = vrot.slane %v326_v8, 7  ;;  %v363_v20 = vrot.slane %v326_v8, 2 }
  0xfe   :  { %v4571_v12 = vpop.f32.mrb[5].mxu0 }
  0xff   :  { %v4572_v15 = vadd.f32 %v4571_v12, %v4570_v11  ;;  %v4573_v16 = vpop.f32.mrb[6].mxu0  ;;  %v343_v17 = vrot.slane %v5830_v10, 1  ;;  %v438_v18 = vpack.c.bf16 %v5830_v10, %v326_v8  ;;  %v386_v19 = vrot.slane %v5830_v10, 7 }
 0x100   :  { %v4574_v21 = vpop.f32.mrb[7].mxu0  ;;  %v364_v22 = vrot.slane %v5830_v10, 2  ;;  %v413_v37 = vrot.slane %v5830_v10, 6 }
 0x101   :  { %v297_v23 = vadd.f32 %v4572_v15, %v5826_v1  ;;  %v4575_v24 = vadd.f32 %v4574_v21, %v4573_v16  ;;  %v344_v25 = vsel %vm247_vm0, %v342_v13, %v343_v17  ;;  %v5839_v26 = vsel %vm384_vm3, %v385_v14, %v386_v19 }
 0x102   :  { %v5842_v27 = vsel %vm362_vm4, %v363_v20, %v364_v22  ;;  %v5204_v20 = vld [vmem:[%s7491_s3 + $0x120] ss:$8 sps:$4 sm:$0xff]  }
 0x103   :  { %v5844_v28 = vmax.f32 %v297_v23, 0.0  ;;  %v300_v29 = vadd.f32 %v4575_v24, %v5826_v1 }
 0x105   :  { %v5847_v30 = vmax.f32 %v300_v29, 0.0  ;;  %v4576_v31 = vpop.f32.mrb[8].mxu0  ;;  %v345_v32 = vrot.slane %v5844_v28, 1  ;;  %v388_v33 = vrot.slane %v5844_v28, 7  ;;  %v366_v34 = vrot.slane %v5844_v28, 2 }
 0x106   :  { %v4577_v35 = vpop.f32.mrb[9].mxu0  ;;  %v442_v36 = vpack.c.bf16 %v5844_v28, %v5830_v10  ;;  %v414_v38 = vrot.slane %v5844_v28, 6  ;;  %v5209_v29 = vld [vmem:[%s7491_s3 + $0x134] ss:$8 sps:$4 sm:$0xff]   ;;  %v5302_v10 = vld [vmem:[%s7491_s3 + $0x324] ss:$8 sps:$4 sm:$0xff]  }
 0x107   :  { %v4578_v39 = vadd.f32 %v4577_v35, %v4576_v31  ;;  %v4579_v40 = vpop.f32.mrb[10].mxu0  ;;  %v5857_v41 = vsel %vm247_vm0, %v343_v17, %v345_v32  ;;  %v347_v42 = vrot.slane %v5847_v30, 1  ;;  %v5862_v43 = vpack.c.bf16 %v5847_v30, %v5844_v28  ;;  %v5373_v28 = vld [vmem:[%s7493_s5 + $0x18] sm:$0xff]  }
 0x108   :  { %v4580_v44 = vpop.f32.mrb[11].mxu0  ;;  %v439_v45 = vpack.c.bf16 %v5857_v41, %v344_v25  ;;  %v5869_v47 = vsel %vm384_vm3, %v386_v19, %v388_v33  ;;  %v5872_v48 = vsel %vm362_vm4, %v364_v22, %v366_v34  ;;  %v390_v49 = vrot.slane %v5847_v30, 7 }
 0x109   :  { %v305_v50 = vadd.f32 %v4578_v39, %v5826_v1  ;;  %v4581_v51 = vadd.f32 %v4580_v44, %v4579_v40  ;;  %v5877_v52 = vsel %vm247_vm0, %v345_v32, %v347_v42  ;;  %v441_v54 = vpack.c.bf16 %v5869_v47, %v5839_v26  ;;  %v5227_v26 = vld [vmem:[%s7491_s3 + $0x194] ss:$8 sps:$4 sm:$0xff]  }
 0x10a   :  { %v443_v55 = vpack.c.bf16 %v5877_v52, %v5857_v41  ;;  %1380 = vmatprep.mubr.bf16.mxu1 %v439_v45  ;;  %v440_v56 = vpack.c.bf16 %v5872_v48, %v5842_v27  ;;  %v5889_v57 = vsel %vm384_vm3, %v388_v33, %v390_v49  ;;  %v368_v58 = vrot.slane %v5847_v30, 2  ;;  %v5207_v45 = vld [vmem:[%s7491_s3 + $0x130] ss:$8 sps:$4 sm:$0xff]   ;;  %v5252_v27 = vld [vmem:[%s7491_s3 + $0x220] ss:$8 sps:$4 sm:$0xff]  }
 0x10b   :  { %v5892_v59 = vmax.f32 %v305_v50, 0.0  ;;  %v308_v60 = vadd.f32 %v4581_v51, %v5826_v1  ;;  %1381 = vmatmul.mubr.bf16.vlgmr.msra.gmra.mrb[0].mxu1 %v438_v18  ;;  %v445_v61 = vpack.c.bf16 %v5889_v57, %v5869_v47  ;;  %v5898_v62 = vsel %vm412_vm5, %v413_v37, %v414_v38  ;;  %v5257_v48 = vld [vmem:[%s7491_s3 + $0x234] ss:$8 sps:$4 sm:$0xff]  }
 0x10c   :  { %1420 = vmatpush1.bf16.msra.mxu1 %v5198_v46  ;;  %v5907_v2 = vsel %vm362_vm4, %v366_v34, %v368_v58  ;;  %v416_v3 = vrot.slane %v5847_v30, 6  ;;  %v5275_v41 = vld [vmem:[%s7491_s3 + $0x294] ss:$8 sps:$4 sm:$0xff]  }
 0x10d   :  { %v5910_v4 = vmax.f32 %v308_v60, 0.0  ;;  %v4582_v5 = vpop.f32.mrb[12].mxu0  ;;  %1421 = vmatprep.subr.bf16.mxu1 %v5203_v53  ;;  %v349_v6 = vrot.slane %v5892_v59, 1  ;;  %v392_v7 = vrot.slane %v5892_v59, 7  ;;  %v370_v8 = vrot.slane %v5892_v59, 2 }
 0x10e   :  { %v4583_v9 = vpop.f32.mrb[13].mxu0  ;;  %v450_v11 = vpack.c.bf16 %v5892_v59, %v5847_v30  ;;  %v5918_v12 = vsel %vm412_vm5, %v414_v38, %v416_v3  ;;  %v418_v13 = vrot.slane %v5892_v59, 6  ;;  %v5212_v53 = vld [vmem:[%s7491_s3 + $0x144] ss:$8 sps:$4 sm:$0xff]   ;;  %v5323_v47 = vld [vmem:[%s7491_s3 + $0x394] ss:$8 sps:$4 sm:$0xff]  }
 0x10f   :  { %v4584_v14 = vadd.f32 %v4583_v9, %v4582_v5  ;;  %v5922_v15 = vsel %vm247_vm0, %v347_v42, %v349_v6  ;;  %v351_v16 = vrot.slane %v5910_v4, 1  ;;  %v5927_v17 = vpack.c.bf16 %v5910_v4, %v5892_v59  ;;  %v4585_v18 = vpop.f32.mrb[14].mxu0  ;;  %v5308_v30 = vld [vmem:[%s7491_s3 + $0x344] ss:$8 sps:$4 sm:$0xff]  }
 0x110   :  { %1422 = vmatpush1.bf16.msra.mxu1 %v5201_v63  ;;  %v447_v19 = vpack.c.bf16 %v5922_v15, %v5877_v52  ;;  %v4586_v21 = vpop.f32.mrb[15].mxu0  ;;  %v5935_v22 = vsel %vm384_vm3, %v390_v49, %v392_v7  ;;  %v5938_v23 = vsel %vm362_vm4, %v368_v58, %v370_v8  ;;  %v394_v24 = vrot.slane %v5910_v4, 7  ;;  %v5273_v52 = vld [vmem:[%s7491_s3 + $0x290] ss:$8 sps:$4 sm:$0xff]   ;;  %v5383_v59 = vld [vmem:[%s7493_s5 + $0x28] sm:$0xff]  }
 0x111   :  { %v313_v25 = vadd.f32 %v4584_v14, %v5826_v1  ;;  %1423 = vmatprep.subr.bf16.mxu1 %v5206_v0  ;;  %v5946_v31 = vsel %vm247_vm0, %v349_v6, %v351_v16  ;;  %v4587_v32 = vadd.f32 %v4586_v21, %v4585_v18  ;;  %v449_v33 = vpack.c.bf16 %v5935_v22, %v5889_v57  ;;  %v5321_v57 = vld [vmem:[%s7491_s3 + $0x390] ss:$8 sps:$4 sm:$0xff]  }
 0x112   :  { %1390 = vmatprep.mubr.bf16.mxu1 %v447_v19  ;;  %v448_v34 = vpack.c.bf16 %v5938_v23, %v5907_v2  ;;  %v5953_v35 = vsel %vm384_vm3, %v392_v7, %v394_v24  ;;  %v372_v37 = vrot.slane %v5910_v4, 2  ;;  %v451_v38 = vpack.c.bf16 %v5946_v31, %v5922_v15  ;;  %v5258_v2 = vld [vmem:[%s7491_s3 + $0x240] ss:$8 sps:$4 sm:$0xff]   ;;  %v5263_v23 = vld [vmem:[%s7491_s3 + $0x254] ss:$8 sps:$4 sm:$0xff]  }
 0x113   :  { %v5958_v39 = vmax.f32 %v313_v25, 0.0  ;;  %1391 = vmatmul.mubr.bf16.gmra.mrb[4].mxu1 %v5862_v43  ;;  %v316_v40 = vadd.f32 %v4587_v32, %v5826_v1  ;;  %v444_v42 = vpack.c.bf16 %v5918_v12, %v5898_v62  ;;  %v453_v44 = vpack.c.bf16 %v5953_v35, %v5935_v22  ;;  %v5300_v15 = vld [vmem:[%s7491_s3 + $0x320] ss:$8 sps:$4 sm:$0xff]   ;;  %v5353_v12 = vld [vmem:[%s7491_s3 + $0x434] ss:$8 sps:$4 sm:$0xff]  }
 0x114   :  { %1424 = vmatpush1.bf16.msra.mxu1 %v5204_v20  ;;  %v5970_v46 = vsel %vm362_vm4, %v370_v8, %v372_v37  ;;  %v5973_v49 = vsel %vm412_vm5, %v416_v3, %v418_v13  ;;  %v420_v50 = vrot.slane %v5910_v4, 6  ;;  %v5348_v62 = vld [vmem:[%s7491_s3 + $0x420] ss:$8 sps:$4 sm:$0xff]  }
 0x115   :  { %1425 = vmatprep.subr.bf16.mxu1 %v5209_v29  ;;  %v353_v51 = vrot.slane %v5958_v39, 1  ;;  %v5980_v58 = vmax.f32 %v316_v40, 0.0  ;;  %v4588_v60 = vpop.f32.mrb[16].mxu0  ;;  %v396_v63 = vrot.slane %v5958_v39, 7  ;;  %v5984_v5 = vrot.slane %v5958_v39, 2 }
 0x116   :  { %v4589_v0 = vpop.f32.mrb[17].mxu0  ;;  %v458_v3 = vpack.c.bf16 %v5958_v39, %v5910_v4  ;;  %v5989_v6 = vsel %vm412_vm5, %v418_v13, %v420_v50  ;;  %v422_v7 = vrot.slane %v5958_v39, 6  ;;  %v5210_v13 = vld [vmem:[%s7491_s3 + $0x140] ss:$8 sps:$4 sm:$0xff]   ;;  %v5215_v29 = vld [vmem:[%s7491_s3 + $0x154] ss:$8 sps:$4 sm:$0xff]  }
 0x117   :  { %v5993_v8 = vsel %vm247_vm0, %v351_v16, %v353_v51  ;;  %v464_v9 = vpack.c.bf16 %v353_v51, %v353_v51  ;;  %v4590_v14 = vadd.f32 %v4589_v0, %v4588_v60  ;;  %v5996_v18 = vsel %vm384_vm3, %v394_v24, %v396_v63  ;;  %v4591_v19 = vpop.f32.mrb[18].mxu0  ;;  %v5216_v60 = vld [vmem:[%s7491_s3 + $0x160] ss:$8 sps:$4 sm:$0xff]  }
 0x118   :  { %1426 = vmatpush1.bf16.msra.mxu1 %v5207_v45  ;;  %v455_v20 = vpack.c.bf16 %v5993_v8, %v5946_v31  ;;  %v457_v21 = vpack.c.bf16 %v5996_v18, %v5953_v35  ;;  %v6007_v16 = vsel %vm362_vm4, %v372_v37, %v5984_v5  ;;  %v398_v25 = vrot.slane %v5980_v58, 7  ;;  %v4592_v24 = vpop.f32.mrb[19].mxu0  ;;  %v5305_v31 = vld [vmem:[%s7491_s3 + $0x334] ss:$8 sps:$4 sm:$0xff]  }
 0x119   :  { %1427 = vmatprep.subr.bf16.mxu1 %v5212_v53  ;;  %v321_v32 = vadd.f32 %v4590_v14, %v5826_v1  ;;  %v456_v40 = vpack.c.bf16 %v6007_v16, %v5970_v46  ;;  %v6017_v45 = vrot.slane %v5980_v58, 1  ;;  %v6025_v53 = vsel %vm412_vm5, %v420_v50, %v422_v7  ;;  %v5269_v16 = vld [vmem:[%s7491_s3 + $0x274] ss:$8 sps:$4 sm:$0xff]  }
 0x11a   :  { %1400 = vmatprep.mubr.bf16.mxu1 %v455_v20  ;;  %v6020_v37 = vsel %vm384_vm3, %v396_v63, %v398_v25  ;;  %v5213_v63 = vld [vmem:[%s7491_s3 + $0x150] ss:$8 sps:$4 sm:$0xff]   ;;  %v424_v19 = vrot.slane %v5980_v58, 6  ;;  %v465_v46 = vpack.c.bf16 %v5984_v5, %v5984_v5  ;;  %v5272_v5 = vld [vmem:[%s7491_s3 + $0x284] ss:$8 sps:$4 sm:$0xff]   ;;  %v467_v4 = vpack.c.bf16 %v5980_v58, %v5980_v58 }
 0x11b   :  { %1401 = vmatmul.mubr.bf16.gmra.mrb[8].mxu1 %v5927_v17  ;;  %v6028_v0 = vmax.f32 %v321_v32, 0.0  ;;  %v6032_v1 = vsel %vm247_vm0, %v353_v51, %v6017_v45  ;;  %v5218_v51 = vld [vmem:[%s7491_s3 + $0x164] ss:$8 sps:$4 sm:$0xff]   ;;  %v463_v32 = vpack.c.bf16 %v5958_v39, %v5958_v39  ;;  %v7506_v22 = vpack.c.bf16 %v5989_v6, %v5973_v49  ;;  %v5354_v49 = vld [vmem:[%s7491_s3 + $0x440] ss:$8 sps:$4 sm:$0xff]  }
 0x11c   :  { %1428 = vmatpush1.bf16.msra.mxu1 %v5210_v13  ;;  %1410 = vmatprep.mubr.bf16.mxu1 %v464_v9  ;;  %v459_v14 = vpack.c.bf16 %v6032_v1, %v5993_v8  ;;  %v6050_v24 = vsel %vm412_vm5, %v422_v7, %v424_v19  ;;  %v5221_v7 = vld [vmem:[%s7491_s3 + $0x174] ss:$8 sps:$4 sm:$0xff]   ;;  %v468_v1 = vpack.c.bf16 %v6017_v45, %v6017_v45  ;;  %v5312_v45 = vld [vmem:[%s7491_s3 + $0x360] ss:$8 sps:$4 sm:$0xff]  }
 0x11d   :  { %1429 = vmatprep.subr.bf16.mxu1 %v5215_v29  ;;  %v426_v13 = vrot.slane %v6028_v0, 6  ;;  %v435_v9 = vrot.slane %v6028_v0, 7  ;;  %v460_v50 = vpack.c.bf16 %v6050_v24, %v6025_v53  ;;  %v5311_v8 = vld [vmem:[%s7491_s3 + $0x354] ss:$8 sps:$4 sm:$0xff]   ;;  %v7507_v35 = vpack.c.bf16 %v6020_v37, %v5996_v18  ;;  %v5363_v24 = vld [vmem:[%s7491_s3 + $0x470] ss:$8 sps:$4 sm:$0xff]  }
 0x11e   :  { %v5359_v6 = vld [vmem:[%s7491_s3 + $0x454] ss:$8 sps:$4 sm:$0xff]  }
 0x11f   :  { %v6057_v20 = vsel %vm384_vm3, %v398_v25, %v435_v9  ;;  %v6060_v29 = vsel %vm412_vm5, %v424_v19, %v426_v13  ;;  %v5219_v25 = vld [vmem:[%s7491_s3 + $0x170] ss:$8 sps:$4 sm:$0xff]   ;;  %v5222_v19 = vld [vmem:[%s7491_s3 + $0x180] ss:$8 sps:$4 sm:$0xff]   ;;  %v5233_v13 = vld [vmem:[%s7491_s3 + $0x1b4] ss:$8 sps:$4 sm:$0xff]  }
 0x120   :  { %1430 = vmatpush1.bf16.msra.mxu1 %v5213_v63  ;;  %v5224_v63 = vld [vmem:[%s7491_s3 + $0x184] ss:$8 sps:$4 sm:$0xff]   ;;  %v5231_v9 = vld [vmem:[%s7491_s3 + $0x1b0] ss:$8 sps:$4 sm:$0xff]   ;;  %v470_v18 = vpack.c.bf16 %v6057_v20, %v6057_v20  ;;  %v5360_v20 = vld [vmem:[%s7491_s3 + $0x460] ss:$8 sps:$4 sm:$0xff]   ;;  %v469_v53 = vpack.c.bf16 %v6060_v29, %v6060_v29 }
 0x121   :  { %1431 = vmatprep.subr.bf16.mxu1 %v5218_v51  ;;  %v5228_v51 = vld [vmem:[%s7491_s3 + $0x1a0] ss:$8 sps:$4 sm:$0xff]  }
 0x122   :  { %v5375_v29 = vld [vmem:[%s7493_s5 + $0x400] sm:$0xff]  }
 0x123   :  { %1411 = vmatmul.mubr.bf16.gmra.mrb[12].mxu1 %v463_v32  ;;  %v5236_v32 = vld [vmem:[%s7491_s3 + $0x1c4] ss:$8 sps:$4 sm:$0xff]  }
 0x124   :  { %1432 = vmatpush1.bf16.msra.mxu1 %v5216_v60  ;;  %1451 = vmatprep.mubr.bf16.mxu1 %v441_v54  ;;  %v5225_v54 = vld [vmem:[%s7491_s3 + $0x190] ss:$8 sps:$4 sm:$0xff]   ;;  %v5230_v60 = vld [vmem:[%s7491_s3 + $0x1a4] ss:$8 sps:$4 sm:$0xff]  }
 0x125   :  { %1433 = vmatprep.subr.bf16.mxu1 %v5221_v7  ;;  %v5234_v7 = vld [vmem:[%s7491_s3 + $0x1c0] ss:$8 sps:$4 sm:$0xff]  }
 0x128   :  { %1434 = vmatpush1.bf16.msra.mxu1 %v5219_v25  ;;  %v5239_v25 = vld [vmem:[%s7491_s3 + $0x1d4] ss:$8 sps:$4 sm:$0xff]  }
 0x129   :  { %1435 = vmatprep.subr.bf16.mxu1 %v5224_v63  ;;  %v5237_v63 = vld [vmem:[%s7491_s3 + $0x1d0] ss:$8 sps:$4 sm:$0xff]  }
 0x12c   :  { %1436 = vmatpush1.bf16.msra.mxu1 %v5222_v19  ;;  %v5242_v19 = vld [vmem:[%s7491_s3 + $0x1e4] ss:$8 sps:$4 sm:$0xff]  }
 0x12d   :  { %1437 = vmatprep.subr.bf16.mxu1 %v5227_v26  ;;  %v5240_v26 = vld [vmem:[%s7491_s3 + $0x1e0] ss:$8 sps:$4 sm:$0xff]  }
 0x130   :  { %1438 = vmatpush1.bf16.msra.mxu1 %v5225_v54  ;;  %v5245_v54 = vld [vmem:[%s7491_s3 + $0x1f4] ss:$8 sps:$4 sm:$0xff]  }
 0x131   :  { %1439 = vmatprep.subr.bf16.mxu1 %v5230_v60  ;;  %v5243_v60 = vld [vmem:[%s7491_s3 + $0x1f0] ss:$8 sps:$4 sm:$0xff]  }
 0x134   :  { %1440 = vmatpush1.bf16.msra.mxu1 %v5228_v51  ;;  %v5248_v51 = vld [vmem:[%s7491_s3 + $0x204] ss:$8 sps:$4 sm:$0xff]  }
 0x135   :  { %1441 = vmatprep.subr.bf16.mxu1 %v5233_v13  ;;  %v5246_v13 = vld [vmem:[%s7491_s3 + $0x200] ss:$8 sps:$4 sm:$0xff]  }
 0x138   :  { %1442 = vmatpush1.bf16.msra.mxu1 %v5231_v9  ;;  %v5251_v9 = vld [vmem:[%s7491_s3 + $0x214] ss:$8 sps:$4 sm:$0xff]  }
 0x139   :  { %1443 = vmatprep.subr.bf16.mxu1 %v5236_v32  ;;  %v5249_v32 = vld [vmem:[%s7491_s3 + $0x210] ss:$8 sps:$4 sm:$0xff]  }
 0x13c   :  { %1444 = vmatpush1.bf16.msra.mxu1 %v5234_v7  ;;  %v5254_v7 = vld [vmem:[%s7491_s3 + $0x224] ss:$8 sps:$4 sm:$0xff]  }
 0x13d   :  { %1445 = vmatprep.subr.bf16.mxu1 %v5239_v25  ;;  %v5266_v25 = vld [vmem:[%s7491_s3 + $0x264] ss:$8 sps:$4 sm:$0xff]  }
 0x140   :  { %1446 = vmatpush1.bf16.msra.mxu1 %v5237_v63  ;;  %v5264_v63 = vld [vmem:[%s7491_s3 + $0x260] ss:$8 sps:$4 sm:$0xff]  }
 0x141   :  { %1447 = vmatprep.subr.bf16.mxu1 %v5242_v19  ;;  %v5270_v19 = vld [vmem:[%s7491_s3 + $0x280] ss:$8 sps:$4 sm:$0xff]  }
 0x144   :  { %1448 = vmatpush1.bf16.msra.mxu1 %v5240_v26  ;;  %v5276_v26 = vld [vmem:[%s7491_s3 + $0x2a0] ss:$8 sps:$4 sm:$0xff]  }
 0x145   :  { %1449 = vmatprep.subr.bf16.mxu1 %v5245_v54  ;;  %v5281_v54 = vld [vmem:[%s7491_s3 + $0x2b4] ss:$8 sps:$4 sm:$0xff]  }
 0x148   :  { %1450 = vmatpush1.bf16.msra.mxu1 %v5243_v60  ;;  %v5279_v60 = vld [vmem:[%s7491_s3 + $0x2b0] ss:$8 sps:$4 sm:$0xff]  }
 0x149   :  { %1490 = vmatprep.subr.bf16.mxu1 %v5248_v51  ;;  %v5284_v51 = vld [vmem:[%s7491_s3 + $0x2c4] ss:$8 sps:$4 sm:$0xff]  }
 0x14b   :  { %1452 = vmatmul.mubr.bf16.vlgmr.msra.gmra.mrb[0].mxu1 %v440_v56  ;;  %v5255_v56 = vld [vmem:[%s7491_s3 + $0x230] ss:$8 sps:$4 sm:$0xff]  }
 0x14c   :  { %1461 = vmatprep.mubr.bf16.mxu1 %v449_v33  ;;  %1491 = vmatpush1.bf16.msra.mxu1 %v5246_v13  ;;  %v5260_v33 = vld [vmem:[%s7491_s3 + $0x244] ss:$8 sps:$4 sm:$0xff]   ;;  %v5282_v13 = vld [vmem:[%s7491_s3 + $0x2c0] ss:$8 sps:$4 sm:$0xff]  }
 0x14d   :  { %1492 = vmatprep.subr.bf16.mxu1 %v5251_v9  ;;  %v5287_v9 = vld [vmem:[%s7491_s3 + $0x2d4] ss:$8 sps:$4 sm:$0xff]  }
 0x150   :  { %1493 = vmatpush1.bf16.msra.mxu1 %v5249_v32  ;;  %v5285_v32 = vld [vmem:[%s7491_s3 + $0x2d0] ss:$8 sps:$4 sm:$0xff]  }
 0x151   :  { %1494 = vmatprep.subr.bf16.mxu1 %v5254_v7  ;;  %v5290_v7 = vld [vmem:[%s7491_s3 + $0x2e4] ss:$8 sps:$4 sm:$0xff]  }
 0x153   :  { %1462 = vmatmul.mubr.bf16.gmra.mrb[4].mxu1 %v448_v34  ;;  %v466_v34 = vpack.c.bf16 %v6020_v37, %v6020_v37  ;;  %v5357_v37 = vld [vmem:[%s7491_s3 + $0x450] ss:$8 sps:$4 sm:$0xff]  }
 0x154   :  { %1471 = vmatprep.mubr.bf16.mxu1 %v457_v21  ;;  %1495 = vmatpush1.bf16.msra.mxu1 %v5252_v27  ;;  %v5261_v21 = vld [vmem:[%s7491_s3 + $0x250] ss:$8 sps:$4 sm:$0xff]   ;;  %v5288_v27 = vld [vmem:[%s7491_s3 + $0x2e0] ss:$8 sps:$4 sm:$0xff]  }
 0x155   :  { %1496 = vmatprep.subr.bf16.mxu1 %v5257_v48  ;;  %v5293_v48 = vld [vmem:[%s7491_s3 + $0x2f4] ss:$8 sps:$4 sm:$0xff]  }
 0x158   :  { %1497 = vmatpush1.bf16.msra.mxu1 %v5255_v56  ;;  %v5366_v56 = vld [vmem:[%s7493_s5 + $0x40] sm:$0xff]  }
 0x159   :  { %1498 = vmatprep.subr.bf16.mxu1 %v5260_v33  ;;  %v5367_v33 = vld [vmem:[%s7493_s5] sm:$0xff]   ;;  %4594 = vmatprep.subr.bf16.mxu0 %v5366_v56 }
 0x15a   :  { %4595 = vmatpush3.bf16.msra.mxu0 %v5367_v33  ;;  %v5336_v56 = vld [vmem:[%s7491_s3 + $0x3e0] ss:$8 sps:$4 sm:$0xff]   ;;  %v5341_v33 = vld [vmem:[%s7491_s3 + $0x3f4] ss:$8 sps:$4 sm:$0xff]  }
 0x15b   :  { %1472 = vmatmul.mubr.bf16.gmra.mrb[8].mxu1 %v456_v40  ;;  %v5267_v40 = vld [vmem:[%s7491_s3 + $0x270] ss:$8 sps:$4 sm:$0xff]  }
 0x15c   :  { %1481 = vmatprep.mubr.bf16.mxu1 %v466_v34  ;;  %1499 = vmatpush1.bf16.msra.mxu1 %v5258_v2  ;;  %v5368_v2 = vld [vmem:[%s7493_s5 + $0x48] sm:$0xff]  }
 0x15d   :  { %1500 = vmatprep.subr.bf16.mxu1 %v5263_v23  ;;  %v5291_v23 = vld [vmem:[%s7491_s3 + $0x2f0] ss:$8 sps:$4 sm:$0xff]   ;;  %v5296_v34 = vld [vmem:[%s7491_s3 + $0x304] ss:$8 sps:$4 sm:$0xff]   ;;  %4596 = vmatprep.subr.bf16.mxu0 %v5368_v2 }
 0x15e   :  { %v5339_v2 = vld [vmem:[%s7491_s3 + $0x3f0] ss:$8 sps:$4 sm:$0xff]  }
 0x160   :  { %1501 = vmatpush1.bf16.msra.mxu1 %v5261_v21  ;;  %v5369_v21 = vld [vmem:[%s7493_s5 + $0x8] sm:$0xff]  }
 0x161   :  { %1502 = vmatprep.subr.bf16.mxu1 %v5266_v25  ;;  %v5370_v25 = vld [vmem:[%s7493_s5 + $0x50] sm:$0xff]   ;;  %4597 = vmatpush3.bf16.msra.mxu0 %v5369_v21 }
 0x162   :  { %4598 = vmatprep.subr.bf16.mxu0 %v5370_v25  ;;  %v5347_v21 = vld [vmem:[%s7491_s3 + $0x414] ss:$8 sps:$4 sm:$0xff]   ;;  %v5345_v25 = vld [vmem:[%s7491_s3 + $0x410] ss:$8 sps:$4 sm:$0xff]  }
 0x163   :  { %1482 = vmatmul.mubr.bf16.gmra.mrb[12].mxu1 %v465_v46  ;;  %v5299_v46 = vld [vmem:[%s7491_s3 + $0x314] ss:$8 sps:$4 sm:$0xff]  }
 0x164   :  { %1503 = vmatpush1.bf16.msra.mxu1 %v5264_v63  ;;  %1522 = vmatprep.mubr.bf16.mxu1 %v443_v55  ;;  %v5278_v55 = vld [vmem:[%s7491_s3 + $0x2a4] ss:$8 sps:$4 sm:$0xff]   ;;  %v5294_v63 = vld [vmem:[%s7491_s3 + $0x300] ss:$8 sps:$4 sm:$0xff]  }
 0x165   :  { %1504 = vmatprep.subr.bf16.mxu1 %v5269_v16  ;;  %v5371_v16 = vld [vmem:[%s7493_s5 + $0x10] sm:$0xff]  }
 0x166   :  { %4599 = vmatpush3.bf16.msra.mxu0 %v5371_v16  ;;  %v5569_v16 = vmov 0  }
 0x168   :  { %1505 = vmatpush1.bf16.msra.mxu1 %v5267_v40  ;;  %v5372_v40 = vld [vmem:[%s7493_s5 + $0x58] sm:$0xff]  }
 0x169   :  { %1506 = vmatprep.subr.bf16.mxu1 %v5272_v5  ;;  %v5297_v5 = vld [vmem:[%s7491_s3 + $0x310] ss:$8 sps:$4 sm:$0xff]   ;;  %4600 = vmatprep.subr.bf16.mxu0 %v5372_v40  ;;  %v5374_v40 = vld [vmem:[%s7493_s5 + $0x440] sm:$0xff]  }
 0x16a   :  { %4601 = vmatpush3.bf16.msra.mxu0 %v5373_v28  ;;  %v5380_v28 = vld [vmem:[%s7493_s5 + $0x450] sm:$0xff]  }
 0x16c   :  { %1507 = vmatpush1.bf16.msra.mxu1 %v5270_v19  ;;  %v5381_v19 = vld [vmem:[%s7493_s5 + $0x68] sm:$0xff]  }
 0x16d   :  { %1508 = vmatprep.subr.bf16.mxu1 %v5275_v41  ;;  %v5303_v41 = vld [vmem:[%s7491_s3 + $0x330] ss:$8 sps:$4 sm:$0xff]  }
 0x170   :  { %1509 = vmatpush1.bf16.msra.mxu1 %v5273_v52  ;;  %v5314_v52 = vld [vmem:[%s7491_s3 + $0x364] ss:$8 sps:$4 sm:$0xff]  }
 0x171   :  { %1510 = vmatprep.subr.bf16.mxu1 %v5278_v55  ;;  %v5315_v55 = vld [vmem:[%s7491_s3 + $0x370] ss:$8 sps:$4 sm:$0xff]  }
 0x174   :  { %1511 = vmatpush1.bf16.msra.mxu1 %v5276_v26  ;;  %v5320_v26 = vld [vmem:[%s7491_s3 + $0x384] ss:$8 sps:$4 sm:$0xff]  }
 0x175   :  { %1512 = vmatprep.subr.bf16.mxu1 %v5281_v54  ;;  %v5318_v54 = vld [vmem:[%s7491_s3 + $0x380] ss:$8 sps:$4 sm:$0xff]  }
 0x178   :  { %1513 = vmatpush1.bf16.msra.mxu1 %v5279_v60  ;;  %v5324_v60 = vld [vmem:[%s7491_s3 + $0x3a0] ss:$8 sps:$4 sm:$0xff]  }
 0x179   :  { %1514 = vmatprep.subr.bf16.mxu1 %v5284_v51  ;;  %v5329_v51 = vld [vmem:[%s7491_s3 + $0x3b4] ss:$8 sps:$4 sm:$0xff]  }
 0x17c   :  { %1515 = vmatpush1.bf16.msra.mxu1 %v5282_v13  ;;  %v5327_v13 = vld [vmem:[%s7491_s3 + $0x3b0] ss:$8 sps:$4 sm:$0xff]  }
 0x17d   :  { %1516 = vmatprep.subr.bf16.mxu1 %v5287_v9  ;;  %v5332_v9 = vld [vmem:[%s7491_s3 + $0x3c4] ss:$8 sps:$4 sm:$0xff]  }
 0x180   :  { %1517 = vmatpush1.bf16.msra.mxu1 %v5285_v32  ;;  %v5330_v32 = vld [vmem:[%s7491_s3 + $0x3c0] ss:$8 sps:$4 sm:$0xff]  }
 0x181   :  { %1518 = vmatprep.subr.bf16.mxu1 %v5290_v7  ;;  %v5335_v7 = vld [vmem:[%s7491_s3 + $0x3d4] ss:$8 sps:$4 sm:$0xff]  }
 0x184   :  { %1519 = vmatpush1.bf16.msra.mxu1 %v5288_v27  ;;  %v5333_v27 = vld [vmem:[%s7491_s3 + $0x3d0] ss:$8 sps:$4 sm:$0xff]  }
 0x185   :  { %1520 = vmatprep.subr.bf16.mxu1 %v5293_v48  ;;  %v5338_v48 = vld [vmem:[%s7491_s3 + $0x3e4] ss:$8 sps:$4 sm:$0xff]  }
 0x188   :  { %1521 = vmatpush1.bf16.msra.mxu1 %v5291_v23  ;;  %v5344_v23 = vld [vmem:[%s7491_s3 + $0x404] ss:$8 sps:$4 sm:$0xff]  }
 0x189   :  { %1561 = vmatprep.subr.bf16.mxu1 %v5296_v34  ;;  %v5342_v34 = vld [vmem:[%s7491_s3 + $0x400] ss:$8 sps:$4 sm:$0xff]  }
 0x18b   :  { %1523 = vmatmul.mubr.bf16.vlgmr.msra.gmra.mrb[0].mxu1 %v442_v36  ;;  %v5376_v36 = vld [vmem:[%s7493_s5 + $0x60] sm:$0xff]  }
 0x18c   :  { %1532 = vmatprep.mubr.bf16.mxu1 %v451_v38  ;;  %1562 = vmatpush1.bf16.msra.mxu1 %v5294_v63  ;;  %v5378_v38 = vld [vmem:[%s7493_s5 + $0x20] sm:$0xff]  }
 0x18d   :  { %1563 = vmatprep.subr.bf16.mxu1 %v5299_v46  ;;  %4602 = vmatprep.subr.bf16.mxu0 %v5376_v36  ;;  %v5350_v63 = vld [vmem:[%s7491_s3 + $0x424] ss:$8 sps:$4 sm:$0xff]   ;;  %v5382_v36 = vld [vmem:[%s7493_s5 + $0x410] sm:$0xff]  }
 0x18e   :  { %4603 = vmatpush3.bf16.msra.mxu0 %v5378_v38  ;;  %v5362_v46 = vld [vmem:[%s7491_s3 + $0x464] ss:$8 sps:$4 sm:$0xff]   ;;  %v5385_v38 = vld [vmem:[%s7493_s5 + $0x418] sm:$0xff]  }
 0x18f   :  { %4604 = vmatprep.subr.bf16.mxu0 %v5381_v19  ;;  %v5387_v19 = vld [vmem:[%s7493_s5 + $0x30] sm:$0xff]  }
 0x190   :  { %1564 = vmatpush1.bf16.msra.mxu1 %v5297_v5  ;;  %v5377_v5 = vld [vmem:[%s7493_s5 + $0x448] sm:$0xff]  }
 0x191   :  { %1565 = vmatprep.subr.bf16.mxu1 %v5302_v10  ;;  %v5379_v10 = vld [vmem:[%s7493_s5 + $0x408] sm:$0xff]  }
 0x192   :  { %4605 = vmatpush3.bf16.msra.mxu0 %v5383_v59  ;;  %v5393_v59 = vld [vmem:[%s7493_s5 + $0x428] sm:$0xff]  }
 0x193   :  { %1533 = vmatmul.mubr.bf16.gmra.mrb[4].mxu1 %v450_v11  ;;  %v5306_v11 = vld [vmem:[%s7491_s3 + $0x340] ss:$8 sps:$4 sm:$0xff]  }
 0x194   :  { %1542 = vmatprep.mubr.bf16.mxu1 %v459_v14  ;;  %1566 = vmatpush1.bf16.msra.mxu1 %v5300_v15  ;;  %v5309_v14 = vld [vmem:[%s7491_s3 + $0x350] ss:$8 sps:$4 sm:$0xff]   ;;  %v7508_v15 = vpack.c.bf16 %v5980_v58, %v5958_v39  ;;  %v5388_v39 = vld [vmem:[%s7493_s5 + $0x460] sm:$0xff]  }
 0x195   :  { %1567 = vmatprep.subr.bf16.mxu1 %v5305_v31  ;;  %v471_v31 = vpack.c.bf16 %v6028_v0, %v6028_v0  ;;  %v5389_v58 = vld [vmem:[%s7493_s5 + $0x420] sm:$0xff]   ;;  %v5390_v0 = vld [vmem:[%s7493_s5 + $0x78] sm:$0xff]  }
 0x198   :  { %1568 = vmatpush1.bf16.msra.mxu1 %v5303_v41  ;;  %v5392_v41 = vld [vmem:[%s7493_s5 + $0x468] sm:$0xff]  }
 0x199   :  { %1569 = vmatprep.subr.bf16.mxu1 %v5308_v30  ;;  %v5391_v30 = vld [vmem:[%s7493_s5 + $0x38] sm:$0xff]  }
 0x19b   :  { %1543 = vmatmul.mubr.bf16.gmra.mrb[8].mxu1 %v458_v3  ;;  %v5317_v3 = vld [vmem:[%s7491_s3 + $0x374] ss:$8 sps:$4 sm:$0xff]  }
 0x19c   :  { %1552 = vmatprep.mubr.bf16.mxu1 %v468_v1  ;;  %1570 = vmatpush1.bf16.msra.mxu1 %v5306_v11  ;;  %v5394_v11 = vld [vmem:[%s7493_s5 + $0xc0] sm:$0xff]   ;;  %v5397_v1 = vld [vmem:[%s7493_s5 + $0x430] sm:$0xff]  }
 0x19d   :  { %1571 = vmatprep.subr.bf16.mxu1 %v5311_v8  ;;  %v5396_v8 = vld [vmem:[%s7493_s5 + $0x470] sm:$0xff]  }
 0x1a0   :  { %1572 = vmatpush1.bf16.msra.mxu1 %v5309_v14  ;;  %v5400_v14 = vld [vmem:[%s7493_s5 + $0x478] sm:$0xff]  }
 0x1a1   :  { %1573 = vmatprep.subr.bf16.mxu1 %v5314_v52  ;;  %v5401_v52 = vld [vmem:[%s7493_s5 + $0x438] sm:$0xff]  }
 0x1a3   :  { %1553 = vmatmul.mubr.bf16.gmra.mrb[12].mxu1 %v467_v4 }
 0x1a4   :  { %1574 = vmatpush1.bf16.msra.mxu1 %v5312_v45  ;;  %1593 = vmatprep.mubr.bf16.mxu1 %v445_v61  ;;  %v5326_v61 = vld [vmem:[%s7491_s3 + $0x3a4] ss:$8 sps:$4 sm:$0xff]   ;;  %v618_v45 = vlaneseq }
 0x1a5   :  { %1575 = vmatprep.subr.bf16.mxu1 %v5317_v3 }
 0x1a6   :  { %v619_v4 = vshrl.u32 %v618_v45, 7 }
 0x1a8   :  { %1576 = vmatpush1.bf16.msra.mxu1 %v5315_v55  ;;  %v620_v3 = vsub.s32 0, %v619_v4  ;;  %v616_v55 = vld [vmem:[%s7492_s4] sm:$0x3] }
 0x1a9   :  { %1577 = vmatprep.subr.bf16.mxu1 %v5320_v26  ;;  %v624_v26 = vsub.s32 1, %v619_v4  ;;  %v5403_v4 = vld [vmem:[%s7493_s5 + $0x90] sm:$0xff]  }
 0x1ac   :  { %1578 = vmatpush1.bf16.msra.mxu1 %v5318_v54  ;;  %v6534_v54 = vrot.slane %v616_v55, %v620_v3 }
 0x1ad   :  { %1579 = vmatprep.subr.bf16.mxu1 %v5323_v47  ;;  %v6536_v47 = vrot.slane %v616_v55, %v624_v26 }
 0x1b0   :  { %1580 = vmatpush1.bf16.msra.mxu1 %v5321_v57 }
 0x1b1   :  { %1581 = vmatprep.subr.bf16.mxu1 %v5326_v61 }
 0x1b4   :  { %1582 = vmatpush1.bf16.msra.mxu1 %v5324_v60 }
 0x1b5   :  { %1583 = vmatprep.subr.bf16.mxu1 %v5329_v51 }
 0x1b8   :  { %1584 = vmatpush1.bf16.msra.mxu1 %v5327_v13 }
 0x1b9   :  { %1585 = vmatprep.subr.bf16.mxu1 %v5332_v9 }
 0x1bc   :  { %1586 = vmatpush1.bf16.msra.mxu1 %v5330_v32 }
 0x1bd   :  { %1587 = vmatprep.subr.bf16.mxu1 %v5335_v7 }
 0x1c0   :  { %1588 = vmatpush1.bf16.msra.mxu1 %v5333_v27 }
 0x1c1   :  { %1589 = vmatprep.subr.bf16.mxu1 %v5338_v48 }
 0x1c4   :  { %1590 = vmatpush1.bf16.msra.mxu1 %v5336_v56 }
 0x1c5   :  { %1591 = vmatprep.subr.bf16.mxu1 %v5341_v33 }
 0x1c8   :  { %1592 = vmatpush1.bf16.msra.mxu1 %v5339_v2 }
 0x1c9   :  { %1632 = vmatprep.subr.bf16.mxu1 %v5344_v23 }
 0x1cb   :  { %1594 = vmatmul.mubr.bf16.vlgmr.msra.gmra.mrb[0].mxu1 %v444_v42  ;;  %v5351_v42 = vld [vmem:[%s7491_s3 + $0x430] ss:$8 sps:$4 sm:$0xff]  }
 0x1cc   :  { %1603 = vmatprep.mubr.bf16.mxu1 %v453_v44  ;;  %1633 = vmatpush1.bf16.msra.mxu1 %v5342_v34  ;;  %v5356_v44 = vld [vmem:[%s7491_s3 + $0x444] ss:$8 sps:$4 sm:$0xff]  }
 0x1cd   :  { %1634 = vmatprep.subr.bf16.mxu1 %v5347_v21 }
 0x1d0   :  { %1635 = vmatpush1.bf16.msra.mxu1 %v5345_v25 }
 0x1d1   :  { %1636 = vmatprep.subr.bf16.mxu1 %v5350_v63 }
 0x1d3   :  { %1604 = vmatmul.mubr.bf16.gmra.mrb[4].mxu1 %v7506_v22 }
 0x1d4   :  { %1613 = vmatprep.mubr.bf16.mxu1 %v7507_v35  ;;  %1637 = vmatpush1.bf16.msra.mxu1 %v5348_v62 }
 0x1d5   :  { %1638 = vmatprep.subr.bf16.mxu1 %v5353_v12 }
 0x1d8   :  { %1639 = vmatpush1.bf16.msra.mxu1 %v5351_v42 }
 0x1d9   :  { %1640 = vmatprep.subr.bf16.mxu1 %v5356_v44 }
 0x1db   :  { %1614 = vmatmul.mubr.bf16.gmra.mrb[8].mxu1 %v460_v50  ;;  %v5365_v50 = vld [vmem:[%s7491_s3 + $0x474] ss:$8 sps:$4 sm:$0xff]  }
 0x1dc   :  { %1623 = vmatprep.mubr.bf16.mxu1 %v470_v18  ;;  %1641 = vmatpush1.bf16.msra.mxu1 %v5354_v49  ;;  %v5395_v49 = vld [vmem:[%s7493_s5 + $0x80] sm:$0xff]  }
 0x1dd   :  { %1642 = vmatprep.subr.bf16.mxu1 %v5359_v6 }
 0x1e0   :  { %1643 = vmatpush1.bf16.msra.mxu1 %v5357_v37 }
 0x1e1   :  { %1644 = vmatprep.subr.bf16.mxu1 %v5362_v46 }
 0x1e3   :  { %1624 = vmatmul.mubr.bf16.gmra.mrb[12].mxu1 %v469_v53  ;;  %v5398_v53 = vld [vmem:[%s7493_s5 + $0xc8] sm:$0xff]  }
 0x1e4   :  { %1645 = vmatpush1.bf16.msra.mxu1 %v5360_v20  ;;  %1664 = vmatprep.mubr.bf16.mxu1 %v5569_v16 }
 0x1e5   :  { %1646 = vmatprep.subr.bf16.mxu1 %v5365_v50 }
 0x1e8   :  { %1647 = vmatpush1.bf16.msra.mxu1 %v5363_v24 }
 0x1e9   :  { %4866 = vmatprep.subr.bf16.mxu1 %v5374_v40 }
 0x1eb   :  { %1665 = vmatmul.mubr.bf16.vlgmr.msra.gmra.mrb[0].mxu1 %v5862_v43  ;;  %v5384_v43 = vld [vmem:[%s7493_s5 + $0x458] sm:$0xff]  }
 0x1ec   :  { %1674 = vmatprep.mubr.bf16.mxu1 %v5569_v16  ;;  %4867 = vmatpush3.bf16.msra.mxu1 %v5375_v29 }
 0x1ed   :  { %4868 = vmatprep.subr.bf16.mxu1 %v5377_v5 }
 0x1f0   :  { %4869 = vmatpush3.bf16.msra.mxu1 %v5379_v10 }
 0x1f1   :  { %4870 = vmatprep.subr.bf16.mxu1 %v5380_v28 }
 0x1f3   :  { %1675 = vmatmul.mubr.bf16.gmra.mrb[4].mxu1 %v5927_v17  ;;  %v5386_v17 = vld [vmem:[%s7493_s5 + $0x70] sm:$0xff]  }
 0x1f4   :  { %1684 = vmatprep.mubr.bf16.mxu1 %v5569_v16  ;;  %4871 = vmatpush3.bf16.msra.mxu1 %v5382_v36 }
 0x1f5   :  { %4872 = vmatprep.subr.bf16.mxu1 %v5384_v43  ;;  %4606 = vmatprep.subr.bf16.mxu0 %v5386_v17  ;;  %v5399_v17 = vld [vmem:[%s7493_s5 + $0x88] sm:$0xff]  }
 0x1f6   :  { %4607 = vmatpush3.bf16.msra.mxu0 %v5387_v19 }
 0x1f7   :  { %4608 = vmatprep.subr.bf16.mxu0 %v5390_v0 }
 0x1f8   :  { %4873 = vmatpush3.bf16.msra.mxu1 %v5385_v38 }
 0x1f9   :  { %4874 = vmatprep.subr.bf16.mxu1 %v5388_v39  ;;  %v5402_v39 = vld [vmem:[%s7493_s5 + $0xd0] sm:$0xff]  }
 0x1fa   :  { %4609 = vmatpush3.bf16.msra.mxu0 %v5391_v30 }
 0x1fb   :  { %1685 = vmatmul.mubr.bf16.gmra.mrb[8].mxu1 %v7508_v15  ;;  %4628 = vmatprep.subr.bf16.mxu0 %v5394_v11 }
 0x1fc   :  { %1694 = vmatprep.mubr.bf16.mxu1 %v5569_v16  ;;  %4875 = vmatpush3.bf16.msra.mxu1 %v5389_v58 }
 0x1fd   :  { %4876 = vmatprep.subr.bf16.mxu1 %v5392_v41 }
 0x200   :  { %4877 = vmatpush3.bf16.msra.mxu1 %v5393_v59 }
 0x201   :  { %4878 = vmatprep.subr.bf16.mxu1 %v5396_v8 }
 0x203   :  { %1695 = vmatmul.mubr.bf16.gmra.mrb[12].mxu1 %v471_v31 }
 0x204   :  { %4879 = vmatpush3.bf16.msra.mxu1 %v5397_v1 }
 0x205   :  { %4880 = vmatprep.subr.bf16.mxu1 %v5400_v14 }
 0x208   :  { %4881 = vmatpush3.bf16.msra.mxu1 %v5401_v52 }
 0x2be   :  { %v1666_v57 = vpop.f32.mrb[0].mxu1 }
 0x2bf   :  { %v5037_v61 = vadd.f32 %v1666_v57, %v6534_v54  ;;  %v1668_v60 = vpop.f32.mrb[1].mxu1 }
 0x2c0   :  { %v5038_v51 = vadd.f32 %v1668_v60, %v6536_v47  ;;  %v1670_v13 = vpop.f32.mrb[2].mxu1  ;;  %v5404_v60 = vld [vmem:[%s7493_s5 + $0xd8] sm:$0xff]  }
 0x2c1   :  { %v1703_v9 = vmax.f32 %v5037_v61, 0.0  ;;  %v5039_v32 = vadd.f32 %v1670_v13, %v6534_v54  ;;  %v1672_v7 = vpop.f32.mrb[3].mxu1 }
 0x2c2   :  { %v1704_v27 = vmax.f32 %v5038_v51, 0.0  ;;  %v5040_v48 = vadd.f32 %v1672_v7, %v6536_v47 }
 0x2c3   :  { %v1727_v56 = vrot.slane %v1703_v9, 1  ;;  %v1755_v33 = vrot.slane %v1703_v9, 2  ;;  %v1785_v2 = vrot.slane %v1703_v9, 7  ;;  %v6542_v23 = vmax.f32 %v5039_v32, 0.0 }
 0x2c4   :  { %v1730_v34 = vrot.slane %v1704_v27, 1  ;;  %v1758_v21 = vrot.slane %v1704_v27, 2  ;;  %v1788_v25 = vrot.slane %v1704_v27, 7  ;;  %v6544_v63 = vmax.f32 %v5040_v48, 0.0 }
 0x2c5   :  { %v1865_v62 = vpack.c.bf16 %v6542_v23, %v1703_v9  ;;  %v1728_v12 = vrot.slane %v6542_v23, 1  ;;  %v1756_v22 = vrot.slane %v6542_v23, 2  ;;  %v1786_v35 = vrot.slane %v6542_v23, 7 }
 0x2c6   :  { %v1676_v42 = vpop.f32.mrb[4].mxu1  ;;  %v1866_v44 = vpack.c.bf16 %v6544_v63, %v1704_v27  ;;  %v1731_v6 = vrot.slane %v6544_v63, 1  ;;  %v1759_v18 = vrot.slane %v6544_v63, 2  ;;  %v1789_v37 = vrot.slane %v6544_v63, 7 }
 0x2c7   :  { %v5041_v46 = vadd.f32 %v1676_v42, %v6534_v54  ;;  %v1678_v20 = vpop.f32.mrb[5].mxu1  ;;  %v6562_v50 = vsel %vm247_vm0, %v1727_v56, %v1728_v12  ;;  %v6565_v24 = vsel %vm362_vm4, %v1755_v33, %v1756_v22  ;;  %v6570_v16 = vsel %vm384_vm3, %v1785_v2, %v1786_v35 }
 0x2c8   :  { %v5042_v40 = vadd.f32 %v1678_v20, %v6536_v47  ;;  %v1680_v29 = vpop.f32.mrb[6].mxu1  ;;  %3108 = vmatprep.mubr.bf16.mxu0 %v1866_v44  ;;  %v6574_v5 = vsel %vm247_vm0, %v1730_v34, %v1731_v6  ;;  %v6577_v10 = vsel %vm362_vm4, %v1758_v21, %v1759_v18  ;;  %v6582_v28 = vsel %vm384_vm3, %v1788_v25, %v1789_v37 }
 0x2c9   :  { %v6584_v36 = vmax.f32 %v5041_v46, 0.0  ;;  %v5043_v43 = vadd.f32 %v1680_v29, %v6534_v54  ;;  %v1682_v15 = vpop.f32.mrb[7].mxu1  ;;  %3109 = vmatmul.mubr.bf16.vlgmr.msra.gmra.mrb[20].mxu0 %v1865_v62 }
 0x2ca   :  { %v6587_v31 = vmax.f32 %v5042_v40, 0.0  ;;  %v5044_v38 = vadd.f32 %v1682_v15, %v6536_v47  ;;  %4629 = vmatpush3.bf16.msra.mxu0 %v5395_v49 }
 0x2cb   :  { %v6593_v19 = vmax.f32 %v5043_v43, 0.0  ;;  %4630 = vmatprep.subr.bf16.mxu0 %v5398_v53  ;;  %v1733_v58 = vrot.slane %v6584_v36, 1  ;;  %v1761_v0 = vrot.slane %v6584_v36, 2  ;;  %v1791_v20 = vrot.slane %v6584_v36, 7 }
 0x2cc   :  { %v6600_v41 = vmax.f32 %v5044_v38, 0.0  ;;  %v1735_v30 = vrot.slane %v6587_v31, 1  ;;  %v1763_v59 = vrot.slane %v6587_v31, 2 }
 0x2cd   :  { %v1881_v11 = vpack.c.bf16 %v6593_v19, %v6584_v36  ;;  %v6607_v8 = vsel %vm247_vm0, %v1728_v12, %v1733_v58  ;;  %v1737_v1 = vrot.slane %v6593_v19, 1  ;;  %v6611_v14 = vsel %vm362_vm4, %v1756_v22, %v1761_v0  ;;  %v5405_v22 = vld [vmem:[%s7493_s5 + $0x98] sm:$0xff]  }
 0x2ce   :  { %4631 = vmatpush3.bf16.msra.mxu0 %v5399_v17  ;;  %v1686_v52 = vpop.f32.mrb[8].mxu1  ;;  %v1882_v45 = vpack.c.bf16 %v6600_v41, %v6587_v31  ;;  %v6619_v3 = vsel %vm247_vm0, %v1731_v6, %v1735_v30  ;;  %v1739_v26 = vrot.slane %v6600_v41, 1  ;;  %v6634_v9 = vsel %vm362_vm4, %v1759_v18, %v1763_v59  ;;  %v5406_v6 = vld [vmem:[%s7493_s5 + $0xe0] sm:$0xff]  }
 0x2cf   :  { %v5045_v57 = vadd.f32 %v1686_v52, %v6534_v54  ;;  %v1688_v61 = vpop.f32.mrb[9].mxu1  ;;  %4632 = vmatprep.subr.bf16.mxu0 %v5402_v39  ;;  %v1868_v51 = vpack.c.bf16 %v6619_v3, %v6574_v5  ;;  %v6631_v13 = vsel %vm247_vm0, %v1733_v58, %v1737_v1  ;;  %v1767_v56 = vrot.slane %v6600_v41, 2  ;;  %v5410_v5 = vld [vmem:[%s7493_s5 + $0xf0] sm:$0xff]  }
 0x2d0   :  { %v5046_v32 = vadd.f32 %v1688_v61, %v6536_v47  ;;  %v1690_v7 = vpop.f32.mrb[10].mxu1  ;;  %3116 = vmatprep.mubr.bf16.mxu0 %v1882_v45  ;;  %3556 = vmatprep.mubr.bf16.mxu1 %v1882_v45  ;;  %v6638_v27 = vsel %vm247_vm0, %v1735_v30, %v1739_v26  ;;  %v1765_v44 = vrot.slane %v6593_v19, 2  ;;  %v1793_v39 = vrot.slane %v6587_v31, 7 }
 0x2d1   :  { %v6643_v33 = vmax.f32 %v5045_v57, 0.0  ;;  %v5047_v2 = vadd.f32 %v1690_v7, %v6534_v54  ;;  %v1692_v34 = vpop.f32.mrb[11].mxu1  ;;  %3117 = vmatmul.mubr.bf16.gmra.mrb[24].mxu0 %v1881_v11  ;;  %3557 = vmatmul.mubr.bf16.vlgmr.msra.gmra.mrb[16].mxu1 %v1881_v11  ;;  %v6657_v42 = vsel %vm362_vm4, %v1763_v59, %v1767_v56  ;;  %v5407_v59 = vld [vmem:[%s7493_s5 + $0xa0] sm:$0xff]   ;;  %v5408_v57 = vld [vmem:[%s7493_s5 + $0xe8] sm:$0xff]  }
 0x2d2   :  { %v6650_v62 = vmax.f32 %v5046_v32, 0.0  ;;  %v5048_v12 = vadd.f32 %v1692_v34, %v6536_v47  ;;  %4633 = vmatpush3.bf16.msra.mxu0 %v5403_v4  ;;  %v6689_v17 = vsel %vm362_vm4, %v1761_v0, %v1765_v44  ;;  %v5415_v0 = vld [vmem:[%s7493_s5 + $0x100] sm:$0xff]  }
 0x2d3   :  { %v6660_v49 = vmax.f32 %v5047_v2, 0.0  ;;  %4634 = vmatprep.subr.bf16.mxu0 %v5404_v60  ;;  %v6666_v18 = vrot.slane %v6643_v33, 1  ;;  %v6669_v46 = vrot.slane %v6643_v33, 2  ;;  %v1899_v4 = vpack.c.bf16 %v6643_v33, %v6643_v33 }
 0x2d4   :  { %v6672_v53 = vmax.f32 %v5048_v12, 0.0  ;;  %v1900_v40 = vpack.c.bf16 %v6650_v62, %v6650_v62  ;;  %v6677_v29 = vrot.slane %v6650_v62, 1  ;;  %v6680_v43 = vrot.slane %v6650_v62, 2 }
 0x2d5   :  { %v1897_v15 = vpack.c.bf16 %v6660_v49, %v6643_v33  ;;  %v6686_v38 = vsel %vm247_vm0, %v1737_v1, %v6666_v18  ;;  %v1797_v1 = vrot.slane %v6600_v41, 7  ;;  %v6721_v7 = vsel %vm362_vm4, %v1765_v44, %v6669_v46 }
 0x2d6   :  { %4635 = vmatpush3.bf16.msra.mxu0 %v5405_v22  ;;  %v1696_v58 = vpop.f32.mrb[12].mxu1  ;;  %3124 = vmatprep.mubr.bf16.mxu0 %v1900_v40  ;;  %v1898_v30 = vpack.c.bf16 %v6672_v53, %v6650_v62  ;;  %v6699_v11 = vsel %vm247_vm0, %v1739_v26, %v6677_v29  ;;  %v6714_v61 = vsel %vm362_vm4, %v1767_v56, %v6680_v43  ;;  %v5409_v22 = vld [vmem:[%s7493_s5 + $0xa8] sm:$0xff]  }
 0x2d7   :  { %v5049_v52 = vadd.f32 %v1696_v58, %v6534_v54  ;;  %v1698_v45 = vpop.f32.mrb[13].mxu1  ;;  %4636 = vmatprep.subr.bf16.mxu0 %v5406_v6  ;;  %v6750_v6 = vsel %vm384_vm3, %v1793_v39, %v1797_v1  ;;  %v1795_v58 = vrot.slane %v6593_v19, 7  ;;  %v1833_v54 = vrot.slane %v6593_v19, 6 }
 0x2d8   :  { %v5050_v60 = vadd.f32 %v1698_v45, %v6536_v47  ;;  %v1700_v32 = vpop.f32.mrb[14].mxu1  ;;  %3564 = vmatprep.mubr.bf16.mxu1 %v1898_v30  ;;  %v6730_v47 = vsel %vm384_vm3, %v1789_v37, %v1793_v39  ;;  %v6747_v37 = vsel %vm384_vm3, %v1786_v35, %v1791_v20  ;;  %v1801_v35 = vrot.slane %v6650_v62, 7 }
 0x2d9   :  { %v6723_v2 = vmax.f32 %v5049_v52, 0.0  ;;  %v1701_v34 = vpop.f32.mrb[15].mxu1  ;;  %3125 = vmatmul.mubr.bf16.gmra.mrb[28].mxu0 %v1899_v4  ;;  %3565 = vmatmul.mubr.bf16.gmra.mrb[20].mxu1 %v1897_v15  ;;  %v1799_v39 = vrot.slane %v6643_v33, 7  ;;  %v7503_v30 = vrot.slane %v6672_v53, 7  ;;  %v5411_v52 = vld [vmem:[%s7493_s5 + $0xb0] sm:$0xff]   ;;  %v5412_v32 = vld [vmem:[%s7493_s5 + $0xf8] sm:$0xff]  }
 0x2da   :  { %v6732_v12 = vmax.f32 %v5050_v60, 0.0  ;;  %4637 = vmatpush3.bf16.msra.mxu0 %v5407_v59  ;;  %3164 = vmatprep.mubr.bf16.mxu0 %v1868_v51  ;;  %v7502_v59 = vrot.slane %v6660_v49, 7  ;;  %v6770_v45 = vsel %vm384_vm3, %v1797_v1, %v1801_v35  ;;  %v6777_v60 = vrot.slane %v6672_v53, 1 }
 0x2db   :  { %4638 = vmatprep.subr.bf16.mxu0 %v5408_v57  ;;  %v1915_v15 = vpack.c.bf16 %v6723_v2, %v6723_v2  ;;  %v6787_v1 = vsel %vm384_vm3, %v1791_v20, %v1795_v58  ;;  %v1830_v20 = vrot.slane %v6544_v63, 6  ;;  %v1859_v48 = vrot.slane %v6723_v2, 7 }
 0x2dc   :  { %v1916_v40 = vpack.c.bf16 %v6732_v12, %v6732_v12  ;;  %v6804_v57 = vsel %vm384_vm3, %v1799_v39, %v7502_v59  ;;  %v1847_v4 = vrot.slane %v6732_v12, 6  ;;  %v1831_v34 = vrot.slane %v6587_v31, 6 }
 0x2dd   :  { %v1835_v51 = vrot.slane %v6600_v41, 6  ;;  %v1861_v44 = vrot.slane %v6732_v12, 7  ;;  %v1839_v12 = vrot.slane %v6650_v62, 6  ;;  %v1837_v59 = vrot.slane %v6643_v33, 6 }
 0x2de   :  { %4639 = vmatpush3.bf16.msra.mxu0 %v5409_v22  ;;  %3572 = vmatprep.mubr.bf16.mxu1 %v1916_v40  ;;  %v6790_v22 = vsel %vm384_vm3, %v1795_v58, %v1799_v39  ;;  %v6795_v40 = vsel %vm384_vm3, %v1801_v35, %v7503_v30  ;;  %v1845_v58 = vrot.slane %v6723_v2, 6  ;;  %v5413_v39 = vld [vmem:[%s7493_s5 + $0xb8] sm:$0xff]   ;;  %v6825_v35 = vrot.slane %v6660_v49, 1  ;;  %v5414_v2 = vld [vmem:[%s7493_s5 + $0x140] sm:$0xff]  }
 0x2df   :  { %4640 = vmatprep.subr.bf16.mxu0 %v5410_v5  ;;  %v1827_v5 = vrot.slane %v6542_v23, 6  ;;  %v6849_v21 = vsel %vm412_vm5, %v1831_v34, %v1835_v51  ;;  %v6870_v26 = vsel %vm412_vm5, %v1835_v51, %v1839_v12  ;;  %v7511_v51 = vpack.c.bf16 %v6607_v8, %v6562_v50 }
 0x2e0   :  { %v6839_v56 = vsel %vm247_vm0, %v6666_v18, %v6825_v35 }
 0x2e1   :  { %3573 = vmatmul.mubr.bf16.gmra.mrb[24].mxu1 %v1915_v15  ;;  %v6822_v15 = vsel %vm247_vm0, %v6677_v29, %v6777_v60 }
 0x2e2   :  { %4641 = vmatpush3.bf16.msra.mxu0 %v5411_v52  ;;  %v6846_v52 = vsel %vm412_vm5, %v1830_v20, %v1831_v34  ;;  %v1843_v20 = vrot.slane %v6672_v53, 6  ;;  %v5416_v34 = vld [vmem:[%s7493_s5 + $0x148] sm:$0xff]  }
 0x2e3   :  { %4642 = vmatprep.subr.bf16.mxu0 %v5412_v32  ;;  %v1828_v32 = vrot.slane %v6584_v36, 6  ;;  %7509 = vst [vmem:[#allocation5_spill] sm:$0xff] %v6846_v52  ;;  %v7514_v52 = vrot.slane %v6660_v49, 7 }
 0x2e4   :  { %v6878_v55 = vsel %vm412_vm5, %v1843_v20, %v1847_v4  ;;  %v7512_v4 = vpack.c.bf16 %v6699_v11, %v6638_v27 }
 0x2e5   :  { %v6858_v30 = vsel %vm412_vm5, %v1827_v5, %v1828_v32  ;;  %v6861_v25 = vsel %vm412_vm5, %v1828_v32, %v1833_v54  ;;  %v1841_v5 = vrot.slane %v6660_v49, 6  ;;  %v6875_v32 = vsel %vm412_vm5, %v1839_v12, %v1843_v20  ;;  %v5417_v20 = vld [vmem:[%s7493_s5 + $0x108] sm:$0xff]  }
 0x2e6   :  { %4643 = vmatpush3.bf16.msra.mxu0 %v5413_v39  ;;  %7510 = vst [vmem:[#allocation6_spill] sm:$0xff] %v6858_v30  ;;  %v1894_v39 = vpack.c.bf16 %v6875_v32, %v6870_v26  ;;  %v6890_v30 = vsel %vm412_vm5, %v1833_v54, %v1837_v59  ;;  %v1895_v54 = vpack.c.bf16 %v6804_v57, %v6790_v22  ;;  %v5500_v26 = vld [vmem:[%s7493_s5 + $0x3d8] sm:$0xff]  }
 0x2e7   :  { %4662 = vmatprep.subr.bf16.mxu0 %v5414_v2  ;;  %v6893_v12 = vsel %vm412_vm5, %v1837_v59, %v1841_v5  ;;  %v5418_v59 = vld [vmem:[%s7493_s5 + $0x150] sm:$0xff]   ;;  %v6919_v2 = vsel %vm384_vm3, %v7514_v52, %v1859_v48  ;;  %v5421_v48 = vld [vmem:[%s7493_s5 + $0x118] sm:$0xff]   ;;  %v5422_v52 = vld [vmem:[%s7493_s5 + $0x160] sm:$0xff]  }
 0x2e8   :  { %v1893_v50 = vpack.c.bf16 %v6893_v12, %v6890_v30  ;;  %v5501_v32 = vld [vmem:[%s7493_s5 + $0x398] sm:$0xff]   ;;  %v5504_v12 = vld [vmem:[%s7493_s5 + $0x3e8] sm:$0xff]  }
 0x2e9   :  { %3165 = vmatmul.mubr.bf16.vlgmr.msra.gmra.mrb[32].mxu0 %v7511_v51  ;;  %v6904_v51 = vsel %vm412_vm5, %v1841_v5, %v1845_v58  ;;  %v5419_v58 = vld [vmem:[%s7493_s5 + $0x110] sm:$0xff]   ;;  %v1902_v5 = vpack.c.bf16 %v6677_v29, %v6677_v29  ;;  %v5423_v29 = vld [vmem:[%s7493_s5 + $0x120] sm:$0xff]  }
 0x2ea   :  { %3172 = vmatprep.mubr.bf16.mxu0 %v7512_v4  ;;  %4663 = vmatpush3.bf16.msra.mxu0 %v5415_v0  ;;  %v7513_v0 = vrot.slane %v6672_v53, 7  ;;  %v1911_v30 = vpack.c.bf16 %v6904_v51, %v6904_v51  ;;  %v5506_v51 = vld [vmem:[%s7493_s5 + $0x3f0] sm:$0xff]  }
 0x2eb   :  { %4664 = vmatprep.subr.bf16.mxu0 %v5416_v34  ;;  %v5420_v34 = vld [vmem:[%s7493_s5 + $0x158] sm:$0xff]  }
 0x2ec   :  { %v6914_v4 = vsel %vm384_vm3, %v7513_v0, %v1861_v44  ;;  %v7515_v44 = vpack.c.bf16 %v6686_v38, %v6631_v13  ;;  %v7516_v0 = vpack.c.bf16 %v6634_v9, %v6577_v10  ;;  %v5428_v10 = vld [vmem:[%s7493_s5 + $0x178] sm:$0xff]  }
 0x2ed   :  { %v5429_v9 = vld [vmem:[%s7493_s5 + $0x138] sm:$0xff]  }
 0x2ee   :  { %4665 = vmatpush3.bf16.msra.mxu0 %v5417_v20  ;;  %v1901_v20 = vpack.c.bf16 %v6666_v18, %v6666_v18  ;;  %v5426_v18 = vld [vmem:[%s7493_s5 + $0x170] sm:$0xff]  }
 0x2ef   :  { %4666 = vmatprep.subr.bf16.mxu0 %v5418_v59  ;;  %v5424_v59 = vld [vmem:[%s7493_s5 + $0x168] sm:$0xff]  }
 0x2f1   :  { %3173 = vmatmul.mubr.bf16.gmra.mrb[36].mxu0 %v7515_v44  ;;  %v5431_v44 = vld [vmem:[%s7493_s5 + $0x180] sm:$0xff]  }
 0x2f2   :  { %3180 = vmatprep.mubr.bf16.mxu0 %v1902_v5  ;;  %4667 = vmatpush3.bf16.msra.mxu0 %v5419_v58  ;;  %v5425_v58 = vld [vmem:[%s7493_s5 + $0x128] sm:$0xff]   ;;  %v5430_v5 = vld [vmem:[%s7493_s5 + $0x1c0] sm:$0xff]  }
 0x2f3   :  { %4668 = vmatprep.subr.bf16.mxu0 %v5420_v34  ;;  %v5427_v34 = vld [vmem:[%s7493_s5 + $0x130] sm:$0xff]  }
 0x2f6   :  { %4669 = vmatpush3.bf16.msra.mxu0 %v5421_v48  ;;  %v5432_v48 = vld [vmem:[%s7493_s5 + $0x1c8] sm:$0xff]  }
 0x2f7   :  { %4670 = vmatprep.subr.bf16.mxu0 %v5422_v52  ;;  %v7517_v52 = vpack.c.bf16 %v6611_v14, %v6565_v24  ;;  %v5435_v24 = vld [vmem:[%s7493_s5 + $0x190] sm:$0xff]   ;;  %v5436_v14 = vld [vmem:[%s7493_s5 + $0x1d8] sm:$0xff]  }
 0x2f9   :  { %3181 = vmatmul.mubr.bf16.gmra.mrb[40].mxu0 %v1901_v20  ;;  %v5433_v20 = vld [vmem:[%s7493_s5 + $0x188] sm:$0xff]  }
 0x2fa   :  { %4671 = vmatpush3.bf16.msra.mxu0 %v5423_v29  ;;  %3220 = vmatprep.mubr.bf16.mxu0 %v7516_v0  ;;  %v7518_v29 = vpack.c.bf16 %v6714_v61, %v6657_v42  ;;  %v1904_v42 = vpack.c.bf16 %v6680_v43, %v6680_v43  ;;  %v7519_v61 = vpack.c.bf16 %v6721_v7, %v6689_v17  ;;  %v5437_v0 = vld [vmem:[%s7493_s5 + $0x198] sm:$0xff]   ;;  %v5439_v43 = vld [vmem:[%s7493_s5 + $0x1a0] sm:$0xff]   ;;  %v5440_v7 = vld [vmem:[%s7493_s5 + $0x1e8] sm:$0xff]  }
 0x2fb   :  { %4672 = vmatprep.subr.bf16.mxu0 %v5424_v59  ;;  %v5434_v59 = vld [vmem:[%s7493_s5 + $0x1d0] sm:$0xff]   ;;  %v1903_v17 = vpack.c.bf16 %v6669_v46, %v6669_v46 }
 0x2fc   :  { %v5442_v46 = vld [vmem:[%s7493_s5 + $0x1f0] sm:$0xff]  }
 0x2fe   :  { %4673 = vmatpush3.bf16.msra.mxu0 %v5425_v58  ;;  %v5438_v58 = vld [vmem:[%s7493_s5 + $0x1e0] sm:$0xff]  }
 0x2ff   :  { %4674 = vmatprep.subr.bf16.mxu0 %v5426_v18  ;;  %v7520_v18 = vpack.c.bf16 %v6730_v47, %v6582_v28  ;;  %v5444_v28 = vld [vmem:[%s7493_s5 + $0x1f8] sm:$0xff]  }
 0x302   :  { %4675 = vmatpush3.bf16.msra.mxu0 %v5427_v34  ;;  %v5441_v34 = vld [vmem:[%s7493_s5 + $0x1a8] sm:$0xff]  }
 0x303   :  { %4676 = vmatprep.subr.bf16.mxu0 %v5428_v10  ;;  %v5443_v10 = vld [vmem:[%s7493_s5 + $0x1b0] sm:$0xff]  }
 0x306   :  { %4677 = vmatpush3.bf16.msra.mxu0 %v5429_v9  ;;  %v5445_v9 = vld [vmem:[%s7493_s5 + $0x1b8] sm:$0xff]  }
 0x307   :  { %4696 = vmatprep.subr.bf16.mxu0 %v5430_v5  ;;  %v5446_v5 = vld [vmem:[%s7493_s5 + $0x240] sm:$0xff]  }
 0x309   :  { %3221 = vmatmul.mubr.bf16.vlgmr.msra.gmra.mrb[44].mxu0 %v7517_v52  ;;  %v7521_v52 = vpack.c.bf16 %v6747_v37, %v6570_v16  ;;  %v5451_v16 = vld [vmem:[%s7493_s5 + $0x210] sm:$0xff]  }
 0x30a   :  { %3228 = vmatprep.mubr.bf16.mxu0 %v7518_v29  ;;  %4697 = vmatpush3.bf16.msra.mxu0 %v5431_v44  ;;  %v5447_v44 = vld [vmem:[%s7493_s5 + $0x200] sm:$0xff]   ;;  %v7522_v29 = vpack.c.bf16 %v6770_v45, %v6750_v6 }
 0x30b   :  { %4698 = vmatprep.subr.bf16.mxu0 %v5432_v48  ;;  %v5448_v48 = vld [vmem:[%s7493_s5 + $0x248] sm:$0xff]  }
 0x30e   :  { %4699 = vmatpush3.bf16.msra.mxu0 %v5433_v20  ;;  %v5449_v20 = vld [vmem:[%s7493_s5 + $0x208] sm:$0xff]  }
 0x30f   :  { %4700 = vmatprep.subr.bf16.mxu0 %v5434_v59  ;;  %v5450_v59 = vld [vmem:[%s7493_s5 + $0x250] sm:$0xff]  }
 0x311   :  { %3229 = vmatmul.mubr.bf16.gmra.mrb[48].mxu0 %v7519_v61  ;;  %v5453_v61 = vld [vmem:[%s7493_s5 + $0x218] sm:$0xff]  }
 0x312   :  { %3236 = vmatprep.mubr.bf16.mxu0 %v1904_v42  ;;  %4701 = vmatpush3.bf16.msra.mxu0 %v5435_v24  ;;  %v5452_v24 = vld [vmem:[%s7493_s5 + $0x258] sm:$0xff]   ;;  %v7523_v42 = vpack.c.bf16 %v6790_v22, %v6787_v1 }
 0x313   :  { %4702 = vmatprep.subr.bf16.mxu0 %v5436_v14  ;;  %v1906_v14 = vpack.c.bf16 %v6795_v40, %v6795_v40 }
 0x316   :  { %4703 = vmatpush3.bf16.msra.mxu0 %v5437_v0  ;;  %v5454_v0 = vld [vmem:[%s7493_s5 + $0x260] sm:$0xff]  }
 0x317   :  { %4704 = vmatprep.subr.bf16.mxu0 %v5438_v58  ;;  %v5455_v58 = vld [vmem:[%s7493_s5 + $0x220] sm:$0xff]  }
 0x319   :  { %3237 = vmatmul.mubr.bf16.gmra.mrb[52].mxu0 %v1903_v17  ;;  %v5456_v17 = vld [vmem:[%s7493_s5 + $0x268] sm:$0xff]  }
 0x31a   :  { %4705 = vmatpush3.bf16.msra.mxu0 %v5439_v43  ;;  %3276 = vmatprep.mubr.bf16.mxu0 %v7520_v18  ;;  %v1905_v43 = vpack.c.bf16 %v6804_v57, %v6804_v57  ;;  %v5457_v18 = vld [vmem:[%s7493_s5 + $0x228] sm:$0xff]  }
 0x31b   :  { %4706 = vmatprep.subr.bf16.mxu0 %v5440_v7  ;;  %v7524_v7 = vpack.c.bf16 %v6587_v31, %v6544_v63  ;;  %v5460_v63 = vld [vmem:[%s7493_s5 + $0x278] sm:$0xff]  }
 0x31c   :  { %v5461_v31 = vld [vmem:[%s7493_s5 + $0x238] sm:$0xff]  }
 0x31e   :  { %4707 = vmatpush3.bf16.msra.mxu0 %v5441_v34  ;;  %v5458_v34 = vld [vmem:[%s7493_s5 + $0x270] sm:$0xff]  }
 0x31f   :  { %4708 = vmatprep.subr.bf16.mxu0 %v5442_v46  ;;  %v5459_v46 = vld [vmem:[%s7493_s5 + $0x230] sm:$0xff]  }
 0x322   :  { %4709 = vmatpush3.bf16.msra.mxu0 %v5443_v10  ;;  %v5462_v10 = vld [vmem:[%s7493_s5 + $0x2c0] sm:$0xff]  }
 0x323   :  { %4710 = vmatprep.subr.bf16.mxu0 %v5444_v28  ;;  %v5463_v28 = vld [vmem:[%s7493_s5 + $0x280] sm:$0xff]  }
 0x326   :  { %4711 = vmatpush3.bf16.msra.mxu0 %v5445_v9  ;;  %v5464_v9 = vld [vmem:[%s7493_s5 + $0x2c8] sm:$0xff]  }
 0x327   :  { %4730 = vmatprep.subr.bf16.mxu0 %v5446_v5  ;;  %v7525_v5 = vpack.c.bf16 %v6584_v36, %v6542_v23  ;;  %v5467_v23 = vld [vmem:[%s7493_s5 + $0x290] sm:$0xff]   ;;  %v5468_v36 = vld [vmem:[%s7493_s5 + $0x2d8] sm:$0xff]  }
 0x329   :  { %3277 = vmatmul.mubr.bf16.vlgmr.msra.gmra.mrb[56].mxu0 %v7521_v52  ;;  %v5466_v52 = vld [vmem:[%s7493_s5 + $0x2d0] sm:$0xff]  }
 0x32a   :  { %3284 = vmatprep.mubr.bf16.mxu0 %v7522_v29  ;;  %4731 = vmatpush3.bf16.msra.mxu0 %v5447_v44  ;;  %v7526_v44 = vpack.c.bf16 %v6650_v62, %v6600_v41  ;;  %v1908_v41 = vpack.c.bf16 %v6672_v53, %v6672_v53  ;;  %v7527_v62 = vpack.c.bf16 %v6643_v33, %v6593_v19  ;;  %v5469_v29 = vld [vmem:[%s7493_s5 + $0x298] sm:$0xff]   ;;  %v5471_v53 = vld [vmem:[%s7493_s5 + $0x2a0] sm:$0xff]   ;;  %v5472_v33 = vld [vmem:[%s7493_s5 + $0x2e8] sm:$0xff]  }
 0x32b   :  { %4732 = vmatprep.subr.bf16.mxu0 %v5448_v48  ;;  %v5465_v48 = vld [vmem:[%s7493_s5 + $0x288] sm:$0xff]   ;;  %v1907_v19 = vpack.c.bf16 %v6660_v49, %v6660_v49  ;;  %v5474_v49 = vld [vmem:[%s7493_s5 + $0x2f0] sm:$0xff]  }
 0x32e   :  { %4733 = vmatpush3.bf16.msra.mxu0 %v5449_v20  ;;  %v5470_v20 = vld [vmem:[%s7493_s5 + $0x2e0] sm:$0xff]  }
 0x32f   :  { %4734 = vmatprep.subr.bf16.mxu0 %v5450_v59  ;;  %v7528_v59 = vpack.c.bf16 %v6638_v27, %v6619_v3  ;;  %v5476_v3 = vld [vmem:[%s7493_s5 + $0x2f8] sm:$0xff]  }
 0x330   :  { %v5477_v27 = vld [vmem:[%s7493_s5 + $0x2b8] sm:$0xff]  }
 0x331   :  { %3285 = vmatmul.mubr.bf16.gmra.mrb[60].mxu0 %v7523_v42  ;;  %v5479_v42 = vld [vmem:[%s7493_s5 + $0x300] sm:$0xff]  }
 0x332   :  { %3292 = vmatprep.mubr.bf16.mxu0 %v1906_v14  ;;  %4735 = vmatpush3.bf16.msra.mxu0 %v5451_v16  ;;  %v5473_v16 = vld [vmem:[%s7493_s5 + $0x2a8] sm:$0xff]   ;;  %v5478_v14 = vld [vmem:[%s7493_s5 + $0x340] sm:$0xff]  }
 0x333   :  { %4736 = vmatprep.subr.bf16.mxu0 %v5452_v24  ;;  %v5475_v24 = vld [vmem:[%s7493_s5 + $0x2b0] sm:$0xff]  }
 0x336   :  { %4737 = vmatpush3.bf16.msra.mxu0 %v5453_v61  ;;  %v5480_v61 = vld [vmem:[%s7493_s5 + $0x348] sm:$0xff]  }
 0x337   :  { %4738 = vmatprep.subr.bf16.mxu0 %v5454_v0  ;;  %v7529_v0 = vpack.c.bf16 %v6631_v13, %v6607_v8  ;;  %v5483_v8 = vld [vmem:[%s7493_s5 + $0x310] sm:$0xff]   ;;  %v5484_v13 = vld [vmem:[%s7493_s5 + $0x358] sm:$0xff]  }
 0x339   :  { %3293 = vmatmul.mubr.bf16.gmra.mrb[64].mxu0 %v1905_v43  ;;  %v5481_v43 = vld [vmem:[%s7493_s5 + $0x308] sm:$0xff]  }
 0x33a   :  { %4739 = vmatpush3.bf16.msra.mxu0 %v5455_v58  ;;  %3332 = vmatprep.mubr.bf16.mxu0 %v7524_v7  ;;  %v7530_v58 = vpack.c.bf16 %v6822_v15, %v6699_v11  ;;  %v1910_v11 = vpack.c.bf16 %v6777_v60, %v6777_v60  ;;  %v7531_v15 = vpack.c.bf16 %v6839_v56, %v6686_v38  ;;  %v5485_v7 = vld [vmem:[%s7493_s5 + $0x318] sm:$0xff]   ;;  %v5487_v60 = vld [vmem:[%s7493_s5 + $0x320] sm:$0xff]   ;;  %v5488_v56 = vld [vmem:[%s7493_s5 + $0x368] sm:$0xff]  }
 0x33b   :  { %4740 = vmatprep.subr.bf16.mxu0 %v5456_v17  ;;  %v5482_v17 = vld [vmem:[%s7493_s5 + $0x350] sm:$0xff]   ;;  %v1909_v38 = vpack.c.bf16 %v6825_v35, %v6825_v35 }
 0x33c   :  { %v5490_v35 = vld [vmem:[%s7493_s5 + $0x370] sm:$0xff]  }
 0x33e   :  { %4741 = vmatpush3.bf16.msra.mxu0 %v5457_v18  ;;  %v5486_v18 = vld [vmem:[%s7493_s5 + $0x360] sm:$0xff]  }
 0x33f   :  { %4742 = vmatprep.subr.bf16.mxu0 %v5458_v34  ;;  %v7532_v34 = vld [vmem:[#allocation5_spill] sm:$0xff] }
 0x342   :  { %4743 = vmatpush3.bf16.msra.mxu0 %v5459_v46  ;;  %v7533_v46 = vpack.c.bf16 %v6849_v21, %v7532_v34  ;;  %v5492_v21 = vld [vmem:[%s7493_s5 + $0x378] sm:$0xff]  }
 0x343   :  { %4744 = vmatprep.subr.bf16.mxu0 %v5460_v63  ;;  %v5489_v63 = vld [vmem:[%s7493_s5 + $0x328] sm:$0xff]  }
 0x346   :  { %4745 = vmatpush3.bf16.msra.mxu0 %v5461_v31  ;;  %v5491_v31 = vld [vmem:[%s7493_s5 + $0x330] sm:$0xff]  }
 0x347   :  { %4764 = vmatprep.subr.bf16.mxu0 %v5462_v10  ;;  %v5493_v10 = vld [vmem:[%s7493_s5 + $0x338] sm:$0xff]  }
 0x349   :  { %3333 = vmatmul.mubr.bf16.vlgmr.msra.gmra.mrb[68].mxu0 %v7525_v5  ;;  %v5496_v5 = vld [vmem:[%s7493_s5 + $0x3c8] sm:$0xff]  }
 0x34a   :  { %3340 = vmatprep.mubr.bf16.mxu0 %v7526_v44  ;;  %4765 = vmatpush3.bf16.msra.mxu0 %v5463_v28  ;;  %v5494_v28 = vld [vmem:[%s7493_s5 + $0x3c0] sm:$0xff]   ;;  %v7534_v44 = vld [vmem:[#allocation6_spill] sm:$0xff] }
 0x34b   :  { %4766 = vmatprep.subr.bf16.mxu0 %v5464_v9  ;;  %v5495_v9 = vld [vmem:[%s7493_s5 + $0x380] sm:$0xff]  }
 0x34e   :  { %4767 = vmatpush3.bf16.msra.mxu0 %v5465_v48  ;;  %v7535_v48 = vpack.c.bf16 %v6861_v25, %v7534_v44  ;;  %v5499_v25 = vld [vmem:[%s7493_s5 + $0x390] sm:$0xff]  }
 0x34f   :  { %4768 = vmatprep.subr.bf16.mxu0 %v5466_v52  ;;  %v5497_v52 = vld [vmem:[%s7493_s5 + $0x388] sm:$0xff]  }
 0x351   :  { %3341 = vmatmul.mubr.bf16.gmra.mrb[72].mxu0 %v7527_v62 }
 0x352   :  { %3348 = vmatprep.mubr.bf16.mxu0 %v1908_v41  ;;  %4769 = vmatpush3.bf16.msra.mxu0 %v5467_v23  ;;  %v5498_v23 = vld [vmem:[%s7493_s5 + $0x3d0] sm:$0xff]   ;;  %v5505_v41 = vld [vmem:[%s7493_s5 + $0x3a8] sm:$0xff]  }
 0x353   :  { %4770 = vmatprep.subr.bf16.mxu0 %v5468_v36  ;;  %v5502_v36 = vld [vmem:[%s7493_s5 + $0x3e0] sm:$0xff]  }
 0x356   :  { %4771 = vmatpush3.bf16.msra.mxu0 %v5469_v29 }
 0x357   :  { %4772 = vmatprep.subr.bf16.mxu0 %v5470_v20 }
 0x359   :  { %3349 = vmatmul.mubr.bf16.gmra.mrb[76].mxu0 %v1907_v19  ;;  %v5507_v19 = vld [vmem:[%s7493_s5 + $0x3b0] sm:$0xff]  }
 0x35a   :  { %4773 = vmatpush3.bf16.msra.mxu0 %v5471_v53  ;;  %3388 = vmatprep.mubr.bf16.mxu0 %v7528_v59  ;;  %v5509_v59 = vld [vmem:[%s7493_s5 + $0x3b8] sm:$0xff]  }
 0x35b   :  { %4774 = vmatprep.subr.bf16.mxu0 %v5472_v33 }
 0x35e   :  { %4775 = vmatpush3.bf16.msra.mxu0 %v5473_v16 }
 0x35f   :  { %4776 = vmatprep.subr.bf16.mxu0 %v5474_v49 }
 0x362   :  { %4777 = vmatpush3.bf16.msra.mxu0 %v5475_v24 }
 0x363   :  { %4778 = vmatprep.subr.bf16.mxu0 %v5476_v3 }
 0x366   :  { %4779 = vmatpush3.bf16.msra.mxu0 %v5477_v27 }
 0x367   :  { %4798 = vmatprep.subr.bf16.mxu0 %v5478_v14 }
 0x369   :  { %3389 = vmatmul.mubr.bf16.vlgmr.msra.gmra.mrb[80].mxu0 %v7529_v0 }
 0x36a   :  { %3396 = vmatprep.mubr.bf16.mxu0 %v7530_v58  ;;  %4799 = vmatpush3.bf16.msra.mxu0 %v5479_v42 }
 0x36b   :  { %4800 = vmatprep.subr.bf16.mxu0 %v5480_v61 }
 0x36e   :  { %4801 = vmatpush3.bf16.msra.mxu0 %v5481_v43 }
 0x36f   :  { %4802 = vmatprep.subr.bf16.mxu0 %v5482_v17 }
 0x371   :  { %3397 = vmatmul.mubr.bf16.gmra.mrb[84].mxu0 %v7531_v15 }
 0x372   :  { %3404 = vmatprep.mubr.bf16.mxu0 %v1910_v11  ;;  %4803 = vmatpush3.bf16.msra.mxu0 %v5483_v8  ;;  %v7537_v8 = vpack.c.bf16 %v6787_v1, %v6747_v37  ;;  %v1914_v37 = vpack.c.bf16 %v6914_v4, %v6914_v4 }
 0x373   :  { %4804 = vmatprep.subr.bf16.mxu0 %v5484_v13  ;;  %v7538_v13 = vpack.c.bf16 %v6795_v40, %v6770_v45 }
 0x376   :  { %4805 = vmatpush3.bf16.msra.mxu0 %v5485_v7 }
 0x377   :  { %4806 = vmatprep.subr.bf16.mxu0 %v5486_v18 }
 0x379   :  { %3405 = vmatmul.mubr.bf16.gmra.mrb[88].mxu0 %v1909_v38 }
 0x37a   :  { %4807 = vmatpush3.bf16.msra.mxu0 %v5487_v60  ;;  %3444 = vmatprep.mubr.bf16.mxu0 %v7533_v46 }
 0x37b   :  { %4808 = vmatprep.subr.bf16.mxu0 %v5488_v56 }
 0x37e   :  { %4809 = vmatpush3.bf16.msra.mxu0 %v5489_v63 }
 0x37f   :  { %4810 = vmatprep.subr.bf16.mxu0 %v5490_v35 }
 0x382   :  { %4811 = vmatpush3.bf16.msra.mxu0 %v5491_v31 }
 0x383   :  { %4812 = vmatprep.subr.bf16.mxu0 %v5492_v21 }
 0x386   :  { %4813 = vmatpush3.bf16.msra.mxu0 %v5493_v10  ;;  %v1913_v10 = vpack.c.bf16 %v6919_v2, %v6919_v2 }
 0x387   :  { %4832 = vmatprep.subr.bf16.mxu0 %v5494_v28  ;;  %v4363_v28 = vld [vmem:[%s7494_s6] ss:$0 sm:$0xff] }
 0x389   :  { %3445 = vmatmul.mubr.bf16.vlgmr.msra.gmra.mrb[92].mxu0 %v7535_v48 }
 0x38a   :  { %3452 = vmatprep.mubr.bf16.mxu0 %v1894_v39  ;;  %4833 = vmatpush3.bf16.msra.mxu0 %v5495_v9  ;;  %v1912_v39 = vpack.c.bf16 %v6878_v55, %v6878_v55  ;;  %v5503_v55 = vld [vmem:[%s7493_s5 + $0x3a0] sm:$0xff]  }
 0x38b   :  { %4834 = vmatprep.subr.bf16.mxu0 %v5496_v5 }
 0x38e   :  { %4835 = vmatpush3.bf16.msra.mxu0 %v5497_v52 }
 0x38f   :  { %4836 = vmatprep.subr.bf16.mxu0 %v5498_v23 }
 0x391   :  { %3453 = vmatmul.mubr.bf16.gmra.mrb[96].mxu0 %v1893_v50  ;;  %v7536_v50 = vpack.c.bf16 %v6750_v6, %v6730_v47  ;;  %v5508_v6 = vld [vmem:[%s7493_s5 + $0x3f8] sm:$0xff]   ;;  %s4179_s5 = sshll.u32 %s5572_s25, 4  ;;  %s4180_s5 = int_to_ptr.vmem [resolvable:$true] %s4179_s5 }
 0x392   :  { %3460 = vmatprep.mubr.bf16.mxu0 %v1912_v39  ;;  %4837 = vmatpush3.bf16.msra.mxu0 %v5499_v25  ;;  %s5544_s1 = scalar_lea.vmem %s4180_s5, 32  ;;  %p5549_p1 = scmp.lt.s32.totalorder %s4180_s5, %s4180_s5 }
 0x393   :  { %4838 = vmatprep.subr.bf16.mxu0 %v5500_v26  ;;  %p5545_p0 = scmp.ne.s32.totalorder %s4180_s5, %s5544_s1  ;;  %p5550_p2 = scmp.lt.s32.totalorder %s5544_s1, %s5544_s1 }
 0x395   :  { %p5551_p3 = por %p5550_p2, %p5549_p1 }
 0x396   :  { %4839 = vmatpush3.bf16.msra.mxu0 %v5501_v32 }
 0x397   :  { %4840 = vmatprep.subr.bf16.mxu0 %v5502_v36  ;;  %p5552_p4 = pnand %p5551_p3, %p5545_p0 }
 0x399   :  { %3461 = vmatmul.mubr.bf16.gmra.mrb[100].mxu0 %v1911_v30 }
 0x39a   :  { %4841 = vmatpush3.bf16.msra.mxu0 %v5503_v55  ;;  %3500 = vmatprep.mubr.bf16.mxu0 %v7536_v50 }
 0x39b   :  { %4842 = vmatprep.subr.bf16.mxu0 %v5504_v12 }
 0x39c   :  { %v4610_v62 = vpop.f32.mrb[20].mxu0 }
 0x39d   :  { %v4611_v29 = vpop.f32.mrb[21].mxu0 }
 0x39e   :  { %v4612_v20 = vadd.f32 %v4611_v29, %v4610_v62  ;;  %4843 = vmatpush3.bf16.msra.mxu0 %v5505_v41  ;;  %v4613_v53 = vpop.f32.mrb[22].mxu0 }
 0x39f   :  { %v4614_v47 = vpop.f32.mrb[23].mxu0  ;;  %4844 = vmatprep.subr.bf16.mxu0 %v5506_v51 }
 0x3a0   :  { %v4615_v33 = vadd.f32 %v4614_v47, %v4613_v53  ;;  %v3111_v5 = vadd.f32 %v4612_v20, %v4363_v28 }
 0x3a2   :  { %4845 = vmatpush3.bf16.msra.mxu0 %v5507_v19  ;;  %v3114_v44 = vadd.f32 %v4615_v33, %v4363_v28 }
 0x3a3   :  { %4846 = vmatprep.subr.bf16.mxu0 %v5508_v6 }
 0x3a4   :  { %v4616_v16 = vpop.f32.mrb[24].mxu0  ;;  %v4882_v49 = vpop.f32.mrb[16].mxu1 }
 0x3a5   :  { %v4617_v24 = vpop.f32.mrb[25].mxu0  ;;  %v4883_v3 = vpop.f32.mrb[17].mxu1 }
 0x3a6   :  { %v4618_v27 = vadd.f32 %v4617_v24, %v4616_v16  ;;  %4847 = vmatpush3.bf16.msra.mxu0 %v5509_v59  ;;  %v7284_v14 = vadd.f32 %v4883_v3, %v4882_v49  ;;  %v4619_v42 = vpop.f32.mrb[26].mxu0  ;;  %v4885_v61 = vpop.f32.mrb[18].mxu1 }
 0x3a7   :  { %v4620_v0 = vpop.f32.mrb[27].mxu0  ;;  %v4886_v58 = vpop.f32.mrb[19].mxu1 }
 0x3a8   :  { %v4621_v43 = vadd.f32 %v4620_v0, %v4619_v42  ;;  %v7286_v17 = vadd.f32 %v4886_v58, %v4885_v61  ;;  %v3119_v39 = vadd.f32 %v4618_v27, %v4363_v28 }
 0x3a9   :  { %3501 = vmatmul.mubr.bf16.vlgmr.msra.gmra.mrb[104].mxu0 %v7537_v8 }
 0x3aa   :  { %3508 = vmatprep.mubr.bf16.mxu0 %v7538_v13  ;;  %v3122_v55 = vadd.f32 %v4621_v43, %v4363_v28 }
 0x3ac   :  { %v4622_v11 = vpop.f32.mrb[28].mxu0  ;;  %v4888_v15 = vpop.f32.mrb[20].mxu1 }
 0x3ad   :  { %v4623_v7 = vpop.f32.mrb[29].mxu0  ;;  %v4889_v18 = vpop.f32.mrb[21].mxu1 }
 0x3ae   :  { %v4624_v60 = vadd.f32 %v4623_v7, %v4622_v11  ;;  %v7294_v38 = vadd.f32 %v4889_v18, %v4888_v15  ;;  %v4625_v56 = vpop.f32.mrb[30].mxu0  ;;  %v4891_v34 = vpop.f32.mrb[22].mxu1 }
 0x3af   :  { %v4626_v46 = vpop.f32.mrb[31].mxu0  ;;  %v4892_v63 = vpop.f32.mrb[23].mxu1 }
 0x3b0   :  { %v7296_v35 = vadd.f32 %v4892_v63, %v4891_v34  ;;  %v3127_v62 = vadd.f32 %v4624_v60, %v4363_v28  ;;  %v5510_v34 = vld [vmem:[%s7495_s7 + $0x40] sm:$0xff]   ;;  %v5517_v28 = vld [vmem:[%s7495_s7 + $0x90] sm:$0xff]  }
 0x3b1   :  { %3509 = vmatmul.mubr.bf16.gmra.mrb[108].mxu0 %v1895_v54  ;;  %v5511_v46 = vld [vmem:[%s7495_s7 + $0x80] sm:$0xff]   ;;  %4900 = vmatprep.subr.bf16.mxu0 %v5510_v34 }
 0x3b2   :  { %3516 = vmatprep.mubr.bf16.mxu0 %v1914_v37  ;;  %v5512_v63 = vld [vmem:[%s7495_s7] sm:$0xff]   ;;  %v5570_v37 = vmov 0.0  }
 0x3b3   :  { %4961 = vmatprep.subr.bf16.mxu1 %v5570_v37  ;;  %4901 = vmatpush3.bf16.msra.mxu0 %v5512_v63 }
 0x3b4   :  { %v4894_v45 = vpop.f32.mrb[24].mxu1  ;;  %4962 = vmatpush3.bf16.msra.mxu1 %v5511_v46  ;;  %4977 = vmatprep.mubr.msk.bf16.mxu1 %vm5571_vm6, %v5570_v37 }
 0x3b5   :  { %v4895_v1 = vpop.f32.mrb[25].mxu1  ;;  %4963 = vmatprep.subr.bf16.mxu1 %v5570_v37 }
 0x3b6   :  { %v7303_v40 = vadd.f32 %v4895_v1, %v4894_v45  ;;  %v4897_v31 = vpop.f32.mrb[26].mxu1  ;;  %v5513_v45 = vld [vmem:[%s7495_s7 + $0x48] sm:$0xff]  }
 0x3b7   :  { %v4898_v21 = vpop.f32.mrb[27].mxu1  ;;  %v5514_v1 = vld [vmem:[%s7495_s7 + $0x88] sm:$0xff]   ;;  %4902 = vmatprep.subr.bf16.mxu0 %v5513_v45 }
 0x3b8   :  { %v5515_v31 = vld [vmem:[%s7495_s7 + $0x8] sm:$0xff]   ;;  %4964 = vmatpush3.bf16.msra.mxu1 %v5514_v1 }
 0x3b9   :  { %3517 = vmatmul.mubr.bf16.gmra.mrb[112].mxu0 %v1913_v10  ;;  %4965 = vmatprep.subr.bf16.mxu1 %v5570_v37  ;;  %v5516_v10 = vld [vmem:[%s7495_s7 + $0x50] sm:$0xff]  }
 0x3ba   :  { %4903 = vmatpush3.bf16.msra.mxu0 %v5515_v31 }
 0x3bb   :  { %4904 = vmatprep.subr.bf16.mxu0 %v5516_v10 }
 0x3bc   :  { %v4644_v4 = vpop.f32.mrb[32].mxu0  ;;  %4966 = vmatpush3.bf16.msra.mxu1 %v5517_v28 }
 0x3bd   :  { %v4645_v9 = vpop.f32.mrb[33].mxu0  ;;  %4967 = vmatprep.subr.bf16.mxu1 %v5570_v37 }
 0x3be   :  { %v4646_v57 = vadd.f32 %v4645_v9, %v4644_v4  ;;  %v4647_v22 = vpop.f32.mrb[34].mxu0 }
 0x3bf   :  { %v4648_v54 = vpop.f32.mrb[35].mxu0 }
 0x3c0   :  { %v3167_v48 = vadd.f32 %v4646_v57, %v3111_v5  ;;  %v4649_v52 = vadd.f32 %v4648_v54, %v4647_v22 }
 0x3c2   :  { %v3170_v23 = vadd.f32 %v4649_v52, %v3114_v44 }
 0x3c4   :  { %v4650_v25 = vpop.f32.mrb[36].mxu0 }
 0x3c5   :  { %v4651_v26 = vpop.f32.mrb[37].mxu0 }
 0x3c6   :  { %v4652_v32 = vadd.f32 %v4651_v26, %v4650_v25  ;;  %v4653_v2 = vpop.f32.mrb[38].mxu0  ;;  %v5518_v26 = vld [vmem:[%s7495_s7 + $0x10] sm:$0xff]  }
 0x3c7   :  { %v4654_v36 = vpop.f32.mrb[39].mxu0  ;;  %4905 = vmatpush3.bf16.msra.mxu0 %v5518_v26 }
 0x3c8   :  { %v3175_v30 = vadd.f32 %v4652_v32, %v3119_v39  ;;  %v4655_v12 = vadd.f32 %v4654_v36, %v4653_v2  ;;  %v5519_v36 = vld [vmem:[%s7495_s7 + $0x58] sm:$0xff]  }
 0x3c9   :  { %4906 = vmatprep.subr.bf16.mxu0 %v5519_v36 }
 0x3ca   :  { %v3178_v50 = vadd.f32 %v4655_v12, %v3122_v55  ;;  %v5520_v55 = vld [vmem:[%s7495_s7 + $0x98] sm:$0xff]   ;;  %v5522_v12 = vld [vmem:[%s7495_s7 + $0x60] sm:$0xff]  }
 0x3cb   :  { %4968 = vmatpush3.bf16.msra.mxu1 %v5520_v55 }
 0x3cc   :  { %v4656_v41 = vpop.f32.mrb[40].mxu0  ;;  %4969 = vmatprep.subr.bf16.mxu1 %v5570_v37 }
 0x3cd   :  { %v4657_v51 = vpop.f32.mrb[41].mxu0 }
 0x3ce   :  { %v4658_v29 = vadd.f32 %v4657_v51, %v4656_v41  ;;  %v4659_v20 = vpop.f32.mrb[42].mxu0  ;;  %v5523_v41 = vld [vmem:[%s7495_s7 + $0xa0] sm:$0xff]  }
 0x3cf   :  { %v4660_v53 = vpop.f32.mrb[43].mxu0  ;;  %4970 = vmatpush3.bf16.msra.mxu1 %v5523_v41 }
 0x3d0   :  { %v3183_v19 = vadd.f32 %v4658_v29, %v3127_v62  ;;  %v5524_v53 = vld [vmem:[%s7495_s7 + $0x20] sm:$0xff]   ;;  %4971 = vmatprep.subr.bf16.mxu1 %v5570_v37 }
 0x3dc   :  { %v4678_v47 = vpop.f32.mrb[44].mxu0 }
 0x3dd   :  { %v4679_v6 = vpop.f32.mrb[45].mxu0 }
 0x3de   :  { %v4680_v33 = vadd.f32 %v4679_v6, %v4678_v47  ;;  %v4681_v59 = vpop.f32.mrb[46].mxu0  ;;  %v5526_v47 = vld [vmem:[%s7495_s7 + $0xa8] sm:$0xff]  }
 0x3df   :  { %v4682_v16 = vpop.f32.mrb[47].mxu0  ;;  %4972 = vmatpush3.bf16.msra.mxu1 %v5526_v47 }
 0x3e0   :  { %v3223_v49 = vadd.f32 %v4680_v33, %v3167_v48  ;;  %v4683_v24 = vadd.f32 %v4682_v16, %v4681_v59  ;;  %v5527_v59 = vld [vmem:[%s7495_s7 + $0x28] sm:$0xff]   ;;  %v5528_v16 = vld [vmem:[%s7495_s7 + $0x70] sm:$0xff]   ;;  %4973 = vmatprep.subr.bf16.mxu1 %v5570_v37 }
 0x3e2   :  { %v3226_v3 = vadd.f32 %v4683_v24, %v3170_v23  ;;  %v5530_v24 = vld [vmem:[%s7495_s7 + $0x30] sm:$0xff]  }
 0x3e4   :  { %v4684_v27 = vpop.f32.mrb[48].mxu0 }
 0x3e5   :  { %v4685_v42 = vpop.f32.mrb[49].mxu0 }
 0x3e6   :  { %v4686_v61 = vadd.f32 %v4685_v42, %v4684_v27  ;;  %v4687_v0 = vpop.f32.mrb[50].mxu0  ;;  %v5532_v27 = vld [vmem:[%s7495_s7 + $0xb8] sm:$0xff]  }
 0x3e7   :  { %v4688_v58 = vpop.f32.mrb[51].mxu0  ;;  %v5533_v42 = vld [vmem:[%s7495_s7 + $0x38] sm:$0xff]  }
 0x3e8   :  { %v3231_v43 = vadd.f32 %v4686_v61, %v3175_v30  ;;  %v4689_v8 = vadd.f32 %v4688_v58, %v4687_v0  ;;  %v5521_v30 = vld [vmem:[%s7495_s7 + $0x18] sm:$0xff]  }
 0x3e9   :  { %4907 = vmatpush3.bf16.msra.mxu0 %v5521_v30 }
 0x3ea   :  { %v3234_v13 = vadd.f32 %v4689_v8, %v3178_v50  ;;  %4908 = vmatprep.subr.bf16.mxu0 %v5522_v12 }
 0x3ec   :  { %v4690_v11 = vpop.f32.mrb[52].mxu0 }
 0x3ed   :  { %v4691_v15 = vpop.f32.mrb[53].mxu0  ;;  %4909 = vmatpush3.bf16.msra.mxu0 %v5524_v53 }
 0x3ee   :  { %v4692_v7 = vadd.f32 %v4691_v15, %v4690_v11  ;;  %v4693_v18 = vpop.f32.mrb[54].mxu0 }
 0x3ef   :  { %v4694_v60 = vpop.f32.mrb[55].mxu0 }
 0x3f0   :  { %v3239_v56 = vadd.f32 %v4692_v7, %v3183_v19  ;;  %v5525_v19 = vld [vmem:[%s7495_s7 + $0x68] sm:$0xff]  }
 0x3f1   :  { %4910 = vmatprep.subr.bf16.mxu0 %v5525_v19 }
 0x3f2   :  { %4911 = vmatpush3.bf16.msra.mxu0 %v5527_v59 }
 0x3f3   :  { %4912 = vmatprep.subr.bf16.mxu0 %v5528_v16 }
 0x3f6   :  { %4913 = vmatpush3.bf16.msra.mxu0 %v5530_v24 }
 0x3fc   :  { %v4712_v21 = vpop.f32.mrb[56].mxu0 }
 0x3fd   :  { %v4713_v4 = vpop.f32.mrb[57].mxu0 }
 0x3fe   :  { %v4714_v9 = vadd.f32 %v4713_v4, %v4712_v21  ;;  %v4715_v5 = vpop.f32.mrb[58].mxu0 }
 0x3ff   :  { %v4716_v57 = vpop.f32.mrb[59].mxu0 }
 0x400   :  { %v3279_v22 = vadd.f32 %v4714_v9, %v3223_v49  ;;  %v4717_v54 = vadd.f32 %v4716_v57, %v4715_v5  ;;  %v5529_v49 = vld [vmem:[%s7495_s7 + $0xb0] sm:$0xff]  }
 0x401   :  { %4974 = vmatpush3.bf16.msra.mxu1 %v5529_v49 }
 0x402   :  { %v3282_v44 = vadd.f32 %v4717_v54, %v3226_v3  ;;  %v5531_v3 = vld [vmem:[%s7495_s7 + $0x78] sm:$0xff]   ;;  %4975 = vmatprep.subr.bf16.mxu1 %v5570_v37 }
 0x403   :  { %4914 = vmatprep.subr.bf16.mxu0 %v5531_v3 }
 0x404   :  { %v4718_v48 = vpop.f32.mrb[60].mxu0  ;;  %4915 = vmatpush3.bf16.msra.mxu0 %v5533_v42 }
 0x405   :  { %v4719_v52 = vpop.f32.mrb[61].mxu0  ;;  %4976 = vmatpush3.bf16.msra.mxu1 %v5532_v27  ;;  %4989 = vmatprep.subr.bf16.mxu0 %v5570_v37 }
 0x406   :  { %v4720_v23 = vadd.f32 %v4719_v52, %v4718_v48  ;;  %v4721_v25 = vpop.f32.mrb[62].mxu0  ;;  %5033 = vmatprep.subr.bf16.mxu1 %v5570_v37 }
 0x407   :  { %v4722_v39 = vpop.f32.mrb[63].mxu0 }
 0x408   :  { %v3287_v32 = vadd.f32 %v4720_v23, %v3231_v43  ;;  %v4723_v2 = vadd.f32 %v4722_v39, %v4721_v25 }
 0x40a   :  { %v3290_v50 = vadd.f32 %v4723_v2, %v3234_v13 }
 0x40c   :  { %v4724_v51 = vpop.f32.mrb[64].mxu0 }
 0x40d   :  { %v4725_v62 = vpop.f32.mrb[65].mxu0 }
 0x40e   :  { %v4726_v29 = vadd.f32 %v4725_v62, %v4724_v51  ;;  %v4727_v20 = vpop.f32.mrb[66].mxu0 }
 0x40f   :  { %v4728_v6 = vpop.f32.mrb[67].mxu0 }
 0x410   :  { %v3295_v33 = vadd.f32 %v4726_v29, %v3239_v56 }
 0x41c   :  { %v4746_v61 = vpop.f32.mrb[68].mxu0 }
 0x41d   :  { %v4747_v0 = vpop.f32.mrb[69].mxu0 }
 0x41e   :  { %v4748_v58 = vadd.f32 %v4747_v0, %v4746_v61  ;;  %v4749_v43 = vpop.f32.mrb[70].mxu0 }
 0x41f   :  { %v4750_v8 = vpop.f32.mrb[71].mxu0 }
 0x420   :  { %v3335_v13 = vadd.f32 %v4748_v58, %v3279_v22  ;;  %v4751_v11 = vadd.f32 %v4750_v8, %v4749_v43 }
 0x422   :  { %v3338_v15 = vadd.f32 %v4751_v11, %v3282_v44 }
 0x424   :  { %v4752_v7 = vpop.f32.mrb[72].mxu0 }
 0x425   :  { %v4753_v18 = vpop.f32.mrb[73].mxu0 }
 0x426   :  { %v4754_v60 = vadd.f32 %v4753_v18, %v4752_v7  ;;  %v4755_v56 = vpop.f32.mrb[74].mxu0 }
 0x427   :  { %v4756_v34 = vpop.f32.mrb[75].mxu0 }
 0x428   :  { %v3343_v46 = vadd.f32 %v4754_v60, %v3287_v32  ;;  %v4757_v63 = vadd.f32 %v4756_v34, %v4755_v56 }
 0x42a   :  { %v3346_v45 = vadd.f32 %v4757_v63, %v3290_v50 }
 0x42c   :  { %v4758_v1 = vpop.f32.mrb[76].mxu0 }
 0x42d   :  { %v4759_v31 = vpop.f32.mrb[77].mxu0 }
 0x42e   :  { %v4760_v21 = vadd.f32 %v4759_v31, %v4758_v1  ;;  %v4761_v10 = vpop.f32.mrb[78].mxu0 }
 0x42f   :  { %v4762_v28 = vpop.f32.mrb[79].mxu0 }
 0x430   :  { %v3351_v4 = vadd.f32 %v4760_v21, %v3295_v33 }
 0x43c   :  { %v4780_v9 = vpop.f32.mrb[80].mxu0 }
 0x43d   :  { %v4781_v5 = vpop.f32.mrb[81].mxu0 }
 0x43e   :  { %v4782_v57 = vadd.f32 %v4781_v5, %v4780_v9  ;;  %v4783_v22 = vpop.f32.mrb[82].mxu0 }
 0x43f   :  { %v4784_v54 = vpop.f32.mrb[83].mxu0 }
 0x440   :  { %v3391_v44 = vadd.f32 %v4782_v57, %v3335_v13  ;;  %v4785_v48 = vadd.f32 %v4784_v54, %v4783_v22 }
 0x442   :  { %v3394_v52 = vadd.f32 %v4785_v48, %v3338_v15 }
 0x444   :  { %v4786_v23 = vpop.f32.mrb[84].mxu0 }
 0x445   :  { %v4787_v25 = vpop.f32.mrb[85].mxu0 }
 0x446   :  { %v4788_v26 = vadd.f32 %v4787_v25, %v4786_v23  ;;  %v4789_v39 = vpop.f32.mrb[86].mxu0 }
 0x447   :  { %v4790_v32 = vpop.f32.mrb[87].mxu0 }
 0x448   :  { %v3399_v2 = vadd.f32 %v4788_v26, %v3343_v46  ;;  %v4791_v36 = vadd.f32 %v4790_v32, %v4789_v39 }
 0x44a   :  { %v3402_v55 = vadd.f32 %v4791_v36, %v3346_v45 }
 0x44c   :  { %v4792_v30 = vpop.f32.mrb[88].mxu0 }
 0x44d   :  { %v4793_v12 = vpop.f32.mrb[89].mxu0 }
 0x44e   :  { %v4794_v50 = vadd.f32 %v4793_v12, %v4792_v30  ;;  %v4795_v41 = vpop.f32.mrb[90].mxu0 }
 0x44f   :  { %v4796_v51 = vpop.f32.mrb[91].mxu0 }
 0x450   :  { %v3407_v62 = vadd.f32 %v4794_v50, %v3351_v4 }
 0x45c   :  { %v4814_v29 = vpop.f32.mrb[92].mxu0 }
 0x45d   :  { %v4815_v20 = vpop.f32.mrb[93].mxu0 }
 0x45e   :  { %v4816_v53 = vadd.f32 %v4815_v20, %v4814_v29  ;;  %v4817_v19 = vpop.f32.mrb[94].mxu0 }
 0x45f   :  { %v4818_v47 = vpop.f32.mrb[95].mxu0 }
 0x460   :  { %v3447_v6 = vadd.f32 %v4816_v53, %v3391_v44  ;;  %v4819_v33 = vadd.f32 %v4818_v47, %v4817_v19 }
 0x462   :  { %v3450_v59 = vadd.f32 %v4819_v33, %v3394_v52 }
 0x464   :  { %v4820_v16 = vpop.f32.mrb[96].mxu0 }
 0x465   :  { %v4821_v49 = vpop.f32.mrb[97].mxu0 }
 0x466   :  { %v4822_v24 = vadd.f32 %v4821_v49, %v4820_v16  ;;  %v4823_v3 = vpop.f32.mrb[98].mxu0 }
 0x467   :  { %v4824_v27 = vpop.f32.mrb[99].mxu0 }
 0x468   :  { %v3455_v42 = vadd.f32 %v4822_v24, %v3399_v2  ;;  %v4825_v61 = vadd.f32 %v4824_v27, %v4823_v3  ;;  %v5535_v3 = vld [vmem:[%s7497_s9 + $0x8] sm:$0xff]  }
 0x46a   :  { %v3458_v0 = vadd.f32 %v4825_v61, %v3402_v55 }
 0x46c   :  { %v4826_v58 = vpop.f32.mrb[100].mxu0 }
 0x46d   :  { %v4827_v43 = vpop.f32.mrb[101].mxu0 }
 0x46e   :  { %v4828_v8 = vadd.f32 %v4827_v43, %v4826_v58  ;;  %v4829_v13 = vpop.f32.mrb[102].mxu0  ;;  %v5536_v43 = vld [vmem:[%s7497_s9 + $0x10] sm:$0xff]  }
 0x46f   :  { %v4830_v11 = vpop.f32.mrb[103].mxu0  ;;  %v5537_v13 = vld [vmem:[%s7497_s9 + $0x18] sm:$0xff]  }
 0x470   :  { %v3463_v15 = vadd.f32 %v4828_v8, %v3407_v62 }
 0x47c   :  { %v4848_v7 = vpop.f32.mrb[104].mxu0 }
 0x47d   :  { %v4849_v18 = vpop.f32.mrb[105].mxu0 }
 0x47e   :  { %v4850_v60 = vadd.f32 %v4849_v18, %v4848_v7  ;;  %v4851_v56 = vpop.f32.mrb[106].mxu0  ;;  %v5538_v7 = vld [vmem:[%s7497_s9 + $0x20] sm:$0xff]   ;;  %v5539_v18 = vld [vmem:[%s7497_s9 + $0x28] sm:$0xff]  }
 0x47f   :  { %v4852_v34 = vpop.f32.mrb[107].mxu0 }
 0x480   :  { %v3503_v46 = vadd.f32 %v4850_v60, %v3447_v6  ;;  %v4853_v63 = vadd.f32 %v4852_v34, %v4851_v56  ;;  %v5540_v60 = vld [vmem:[%s7497_s9 + $0x30] sm:$0xff]   ;;  %v5541_v56 = vld [vmem:[%s7497_s9 + $0x38] sm:$0xff]   ;;  %v5542_v34 = vld [vmem:[%s7499_s11] sm:$0xff]  }
 0x482   :  { %v3559_v45 = vadd.f32 %v7284_v14, %v3503_v46  ;;  %v3506_v1 = vadd.f32 %v4853_v63, %v3450_v59 }
 0x484   :  { %v3580_v31 = vmax.f32 %v3559_v45, 0.0  ;;  %v3562_v21 = vadd.f32 %v7286_v17, %v3506_v1  ;;  %v4854_v10 = vpop.f32.mrb[108].mxu0  ;;  %v4508_v1 = vld [vmem:[%s7496_s8] ss:$0 sm:$0xff] }
 0x485   :  { %v4855_v28 = vpop.f32.mrb[109].mxu0 }
 0x486   :  { %v3581_v4 = vmax.f32 %v3562_v21, 0.0  ;;  %v4856_v9 = vadd.f32 %v4855_v28, %v4854_v10  ;;  %v4857_v5 = vpop.f32.mrb[110].mxu0  ;;  %v3604_v57 = vrot.slane %v3580_v31, 2  ;;  %v3590_v23 = vrot.slane %v3580_v31, 1 }
 0x487   :  { %v4858_v22 = vpop.f32.mrb[111].mxu0 }
 0x488   :  { %v3605_v54 = vrot.slane %v3581_v4, 2  ;;  %v3618_v44 = vpack.c.bf16 %v3581_v4, %v3580_v31  ;;  %v3511_v48 = vadd.f32 %v4856_v9, %v3455_v42  ;;  %v4859_v52 = vadd.f32 %v4858_v22, %v4857_v5 }
 0x489   :  { %v3591_v25 = vrot.slane %v3581_v4, 1 }
 0x48a   :  { %v3567_v26 = vadd.f32 %v7294_v38, %v3511_v48  ;;  %v3514_v14 = vadd.f32 %v4859_v52, %v3458_v0  ;;  %v3606_v39 = vsel %vm362_vm4, %v3604_v57, %v3605_v54 }
 0x48b   :  { %v3592_v17 = vsel %vm247_vm0, %v3590_v23, %v3591_v25 }
 0x48c   :  { %v3582_v32 = vmax.f32 %v3567_v26, 0.0  ;;  %v3570_v2 = vadd.f32 %v7296_v35, %v3514_v14  ;;  %v4860_v36 = vpop.f32.mrb[112].mxu0  ;;  %v5534_v35 = vld [vmem:[%s7497_s9] sm:$0xff]  }
 0x48d   :  { %v4861_v55 = vpop.f32.mrb[113].mxu0 }
 0x48e   :  { %v3607_v30 = vrot.slane %v3582_v32, 2  ;;  %v3583_v12 = vmax.f32 %v3570_v2, 0.0  ;;  %v4862_v50 = vadd.f32 %v4861_v55, %v4860_v36  ;;  %v4863_v41 = vpop.f32.mrb[114].mxu0  ;;  %v3593_v51 = vrot.slane %v3582_v32, 1 }
 0x48f   :  { %v4864_v62 = vpop.f32.mrb[115].mxu0 }
 0x490   :  { %v3519_v29 = vadd.f32 %v4862_v50, %v3463_v15  ;;  %v3594_v20 = vsel %vm247_vm0, %v3591_v25, %v3593_v51  ;;  %v3608_v38 = vsel %vm362_vm4, %v3605_v54, %v3607_v30  ;;  %v3595_v53 = vrot.slane %v3583_v12, 1 }
 0x491   :  { %v3619_v19 = vpack.c.bf16 %v3594_v20, %v3592_v17  ;;  %v3620_v47 = vpack.c.bf16 %v3608_v38, %v3606_v39  ;;  %v3609_v6 = vrot.slane %v3583_v12, 2  ;;  %v3621_v33 = vpack.c.bf16 %v3583_v12, %v3582_v32 }
 0x492   :  { %v3575_v59 = vadd.f32 %v7303_v40, %v3519_v29  ;;  %v3596_v16 = vsel %vm247_vm0, %v3593_v51, %v3595_v53 }
 0x493   :  { %3858 = vmatprep.mubr.bf16.mxu0 %v3619_v19  ;;  %4978 = vmatmul.mubr.bf16.vlgmr.msra.gmra.mrb[28].mxu1 %v3620_v47  ;;  %v3610_v49 = vsel %vm362_vm4, %v3607_v30, %v3609_v6 }
 0x494   :  { %v3584_v24 = vmax.f32 %v3575_v59, 0.0  ;;  %3859 = vmatmul.mubr.bf16.vlgmr.msra.gmra.mrb[116].mxu0 %v3618_v44  ;;  %4981 = vmatprep.mubr.msk.bf16.mxu1 %vm5571_vm6, %v5570_v37 }
 0x495   :  { %4990 = vmatpush3.bf16.msra.mxu0 %v5534_v35  ;;  %5035 = vmatpush3.bf16.msra.mxu1 %v5542_v34 }
 0x496   :  { %v3597_v27 = vrot.slane %v3584_v24, 1  ;;  %v3611_v42 = vrot.slane %v3584_v24, 2  ;;  %4991 = vmatprep.subr.bf16.mxu0 %v5570_v37  ;;  %v3624_v15 = vpack.c.bf16 %v3584_v24, %v3584_v24  ;;  %5034 = vmatprep.subr.bf16.mxu1 %v5570_v37 }
 0x498   :  { %v3598_v40 = vsel %vm247_vm0, %v3595_v53, %v3597_v27  ;;  %v3612_v61 = vsel %vm362_vm4, %v3609_v6, %v3611_v42  ;;  %v3625_v8 = vpack.c.bf16 %v3597_v27, %v3597_v27  ;;  %v3626_v11 = vpack.c.bf16 %v3611_v42, %v3611_v42  ;;  %v5543_v42 = vld [vmem:[%s7499_s11 + $0x8] sm:$0xff]  }
 0x499   :  { %v3622_v0 = vpack.c.bf16 %v3598_v40, %v3596_v16  ;;  %v3623_v58 = vpack.c.bf16 %v3612_v61, %v3610_v49  ;;  %4992 = vmatpush3.bf16.msra.mxu0 %v5535_v3  ;;  %5036 = vmatpush3.bf16.msra.mxu1 %v5543_v42  ;;  %v4533_v40 = vld [vmem:[%s7498_s10] ss:$0 sm:$0xff] }
 0x49a   :  { %4993 = vmatprep.subr.bf16.mxu0 %v5570_v37 }
 0x49b   :  { %3866 = vmatprep.mubr.bf16.mxu0 %v3622_v0  ;;  %4982 = vmatmul.mubr.bf16.gmra.mrb[32].mxu1 %v3623_v58 }
 0x49c   :  { %3867 = vmatmul.mubr.bf16.gmra.mrb[120].mxu0 %v3621_v33  ;;  %4985 = vmatprep.mubr.msk.bf16.mxu1 %vm5571_vm6, %v5570_v37 }
 0x49d   :  { %3874 = vmatprep.mubr.bf16.mxu0 %v3625_v8  ;;  %4994 = vmatpush3.bf16.msra.mxu0 %v5536_v43 }
 0x49e   :  { %4995 = vmatprep.subr.bf16.mxu0 %v5570_v37 }
 0x4a1   :  { %4996 = vmatpush3.bf16.msra.mxu0 %v5537_v13 }
 0x4a2   :  { %4997 = vmatprep.subr.bf16.mxu0 %v5570_v37 }
 0x4a3   :  { %4986 = vmatmul.mubr.bf16.gmra.mrb[36].mxu1 %v3626_v11 }
 0x4a4   :  { %3875 = vmatmul.mubr.bf16.gmra.mrb[124].mxu0 %v3624_v15  ;;  %5025 = vmatprep.mubr.msk.bf16.mxu1 %vm5571_vm6, %v5570_v37 }
 0x4a5   :  { %5005 = vmatprep.mubr.msk.bf16.mxu0 %vm5571_vm6, %v5570_v37  ;;  %4998 = vmatpush3.bf16.msra.mxu0 %v5538_v7 }
 0x4a6   :  { %4999 = vmatprep.subr.bf16.mxu0 %v5570_v37 }
 0x4a9   :  { %5000 = vmatpush3.bf16.msra.mxu0 %v5539_v18 }
 0x4aa   :  { %5001 = vmatprep.subr.bf16.mxu0 %v5570_v37 }
 0x4ad   :  { %5002 = vmatpush3.bf16.msra.mxu0 %v5540_v60 }
 0x4ae   :  { %5003 = vmatprep.subr.bf16.mxu0 %v5570_v37 }
 0x4b1   :  { %5004 = vmatpush3.bf16.msra.mxu0 %v5541_v56 }
 0x4b2   :  { %5017 = vmatprep.subr.bf16.mxu0 %v5570_v37 }
 0x566   :  { %v3916_v46 = vpop.f32.mrb[28].mxu1 }
 0x567   :  { %v4916_v63 = vpop.f32.mrb[116].mxu0  ;;  %v4979_v45 = vpop.f32.mrb[29].mxu1 }
 0x568   :  { %v4917_v31 = vpop.f32.mrb[117].mxu0  ;;  %v3919_v21 = vpop.f32.mrb[30].mxu1 }
 0x569   :  { %v4918_v10 = vadd.f32 %v4917_v31, %v4916_v63  ;;  %v4919_v28 = vpop.f32.mrb[118].mxu0  ;;  %v4980_v4 = vpop.f32.mrb[31].mxu1 }
 0x56a   :  { %v4920_v9 = vpop.f32.mrb[119].mxu0 }
 0x56b   :  { %v3861_v5 = vadd.f32 %v4918_v10, %v4508_v1  ;;  %v4921_v57 = vadd.f32 %v4920_v9, %v4919_v28 }
 0x56d   :  { %v3917_v22 = vadd.f32 %v3916_v46, %v3861_v5  ;;  %v3864_v54 = vadd.f32 %v4921_v57, %v4508_v1 }
 0x56e   :  { %v3924_v44 = vpop.f32.mrb[32].mxu1 }
 0x56f   :  { %v3920_v48 = vadd.f32 %v3919_v21, %v3864_v54  ;;  %v4922_v52 = vpop.f32.mrb[120].mxu0  ;;  %v4983_v23 = vpop.f32.mrb[33].mxu1  ;;  %v3938_v14 = vmax.f32 %v3917_v22, 0.0 }
 0x570   :  { %v4923_v25 = vpop.f32.mrb[121].mxu0  ;;  %v3927_v26 = vpop.f32.mrb[34].mxu1 }
 0x571   :  { %v3939_v39 = vmax.f32 %v3920_v48, 0.0  ;;  %v4924_v17 = vadd.f32 %v4923_v25, %v4922_v52  ;;  %v4925_v32 = vpop.f32.mrb[122].mxu0  ;;  %v4984_v2 = vpop.f32.mrb[35].mxu1 }
 0x572   :  { %v4926_v36 = vpop.f32.mrb[123].mxu0 }
 0x573   :  { %v3943_v55 = vpack.c.bf16 %v3939_v39, %v3938_v14  ;;  %v3869_v30 = vadd.f32 %v4924_v17, %v4508_v1  ;;  %v4927_v12 = vadd.f32 %v4926_v36, %v4925_v32  ;;  %v4542_v14 = vld [vmem:[%s7500_s12] ss:$0 sm:$0xff] }
 0x575   :  { %v3925_v50 = vadd.f32 %v3924_v44, %v3869_v30  ;;  %v3872_v41 = vadd.f32 %v4927_v12, %v4508_v1  ;;  %5006 = vmatmul.mubr.bf16.vlgmr.msra.gmra.mrb[128].mxu0 %v3943_v55 }
 0x576   :  { %v3932_v51 = vpop.f32.mrb[36].mxu1  ;;  %5009 = vmatprep.mubr.msk.bf16.mxu0 %vm5571_vm6, %v5570_v37  ;;  %5018 = vmatpush3.bf16.msra.mxu0 %v5542_v34 }
 0x577   :  { %v3928_v62 = vadd.f32 %v3927_v26, %v3872_v41  ;;  %v4928_v29 = vpop.f32.mrb[124].mxu0  ;;  %v4987_v20 = vpop.f32.mrb[37].mxu1  ;;  %5019 = vmatprep.subr.bf16.mxu0 %v5570_v37  ;;  %v3940_v19 = vmax.f32 %v3925_v50, 0.0 }
 0x578   :  { %v4929_v38 = vpop.f32.mrb[125].mxu0  ;;  %v3935_v53 = vpop.f32.mrb[38].mxu1 }
 0x579   :  { %v3941_v47 = vmax.f32 %v3928_v62, 0.0  ;;  %v4930_v6 = vadd.f32 %v4929_v38, %v4928_v29  ;;  %v4931_v33 = vpop.f32.mrb[126].mxu0  ;;  %v4988_v35 = vpop.f32.mrb[39].mxu1 }
 0x57a   :  { %v4932_v59 = vpop.f32.mrb[127].mxu0  ;;  %5020 = vmatpush3.bf16.msra.mxu0 %v5543_v42 }
 0x57b   :  { %v3877_v16 = vadd.f32 %v4930_v6, %v4508_v1  ;;  %v3944_v49 = vpack.c.bf16 %v3941_v47, %v3940_v19 }
 0x57d   :  { %v3933_v24 = vadd.f32 %v3932_v51, %v3877_v16  ;;  %5010 = vmatmul.mubr.bf16.gmra.mrb[132].mxu0 %v3944_v49 }
 0x57e   :  { %5013 = vmatprep.mubr.msk.bf16.mxu0 %vm5571_vm6, %v5570_v37 }
 0x57f   :  { %v3942_v3 = vmax.f32 %v3933_v24, 0.0 }
 0x581   :  { %v3945_v27 = vpack.c.bf16 %v3942_v3, %v3942_v3 }
 0x585   :  { %5014 = vmatmul.mubr.bf16.gmra.mrb[136].mxu0 %v3945_v27 }
 0x586   :  { %5021 = vmatprep.mubr.msk.bf16.mxu0 %vm5571_vm6, %v5570_v37 }
 0x648   :  { %v4051_v61 = vpop.f32.mrb[128].mxu0 }
 0x649   :  { %v4052_v0 = vadd.f32 %v4533_v40, %v4051_v61  ;;  %v5007_v58 = vpop.f32.mrb[129].mxu0 }
 0x64a   :  { %v4054_v43 = vpop.f32.mrb[130].mxu0 }
 0x64b   :  { %v4055_v8 = vadd.f32 %v4533_v40, %v4054_v43  ;;  %v5008_v13 = vpop.f32.mrb[131].mxu0  ;;  %v4073_v11 = vmax.f32 %v4052_v0, 0.0 }
 0x64d   :  { %v4074_v15 = vmax.f32 %v4055_v8, 0.0 }
 0x64f   :  { %v4078_v7 = vpack.c.bf16 %v4074_v15, %v4073_v11 }
 0x650   :  { %v4059_v18 = vpop.f32.mrb[132].mxu0 }
 0x651   :  { %v4060_v60 = vadd.f32 %v4533_v40, %v4059_v18  ;;  %v5011_v56 = vpop.f32.mrb[133].mxu0  ;;  %5022 = vmatmul.mubr.msk.bf16.vlgmr.msra.gmra.mrb[140].mxu0 %vm4104_vm7, %v4078_v7 }
 0x652   :  { %v4062_v34 = vpop.f32.mrb[134].mxu0 }
 0x653   :  { %v4063_v46 = vadd.f32 %v4533_v40, %v4062_v34  ;;  %v5012_v63 = vpop.f32.mrb[135].mxu0  ;;  %v4075_v45 = vmax.f32 %v4060_v60, 0.0 }
 0x655   :  { %v4076_v1 = vmax.f32 %v4063_v46, 0.0 }
 0x657   :  { %v4079_v31 = vpack.c.bf16 %v4076_v1, %v4075_v45 }
 0x658   :  { %v4067_v21 = vpop.f32.mrb[136].mxu0 }
 0x659   :  { %v4068_v10 = vadd.f32 %v4533_v40, %v4067_v21  ;;  %v5015_v28 = vpop.f32.mrb[137].mxu0  ;;  %5026 = vmatmul.mubr.msk.bf16.vlgmr.msra.gmra.mrb[40].mxu1 %vm4104_vm7, %v4079_v31 }
 0x65a   :  { %v4070_v4 = vpop.f32.mrb[138].mxu0  ;;  %5029 = vmatprep.mubr.msk.bf16.mxu1 %vm5571_vm6, %v5570_v37 }
 0x65b   :  { %v4077_v9 = vmax.f32 %v4068_v10, 0.0  ;;  %v5016_v5 = vpop.f32.mrb[139].mxu0 }
 0x65d   :  { %v4080_v57 = vpack.c.bf16 %v4077_v9, %v4077_v9 }
 0x661   :  { %5030 = vmatmul.mubr.msk.bf16.gmra.mrb[44].mxu1 %vm4104_vm7, %v4080_v57 }
 0x724   :  { %v4148_v22 = vpop.f32.mrb[140].mxu0 }
 0x725   :  { %v5023_v54 = vpop.f32.mrb[141].mxu0  ;;  %v4149_v2 = vadd.f32 %v4542_v14, %v4148_v22 }
 0x726   :  { %v4151_v44 = vpop.f32.mrb[142].mxu0 }
 0x727   :  { %v5024_v48 = vpop.f32.mrb[143].mxu0 }
 0x72c   :  { %v4155_v52 = vpop.f32.mrb[40].mxu1 }
 0x72d   :  { %v5027_v23 = vpop.f32.mrb[41].mxu1 }
 0x72e   :  { %v4157_v25 = vpop.f32.mrb[42].mxu1 }
 0x72f   :  { %v5028_v26 = vpop.f32.mrb[43].mxu1 }
 0x734   :  { %v4161_v39 = vpop.f32.mrb[44].mxu1 }
 0x735   :  { %v4162_v17 = vadd.f32 %v4542_v14, %v4161_v39  ;;  %v5031_v37 = vpop.f32.mrb[45].mxu1 }
 0x736   :  { %v4164_v32 = vpop.f32.mrb[46].mxu1 }
 0x737   :  { %v4168_v36 = vrot.slane %v4162_v17, 2  ;;  %v5032_v55 = vpop.f32.mrb[47].mxu1 }
 0x739   :  { %v4170_v30 = vsel %vm384_vm3, %v4149_v2, %v4168_v36 }
 0x73a   :  { %4172 = vst.msk [vmem:[#allocation2] sm:$0x3] %vm4171_vm8, %v4170_v30 }
 0x73b   :  { %5555 = shalt.err (!%p5552_p4)
}
 0x73c   :  { %s5556_s6 = scalar_lea.hbm %s7501_s13, 32 }
 0x73d   :  { %p5557_p5 = scmp.ne.s32.totalorder %s7501_s13, %s5556_s6  ;;  %p5560_p6 = scmp.lt.u32.totalorder %s5556_s6, %s7501_s13 }
 0x73f   :  { %p5562_p7 = pnand %p5560_p6, %p5557_p5 }
 0x741   :  { %5565 = shalt.err (!%p5562_p7)
}
 0x742   :  { %4182 = dma.vmem_to_hbm [thread:$0]  %s4180_s5, 32, %s7501_s13, [#allocation3]  }
 0x743   :  { %5566 = dma.done.wait [#allocation3], 32  }
 0x744   :  { %5567 = vsyncadd [#allocation3], 4294967264 }
 0x745   :  { %4186 = vsyncpa [#allocation3], 1 }

</bundles_post_ra>
